<compile_context>
chip_gen: v6e
topology: v6e:2x2x1
jax: 0.10.0
libtpu: 0.0.40
codegen_flags: <defaults>
</compile_context>

<pallas_src>
import functools

import jax
import jax.numpy as jnp
from jax import lax
from jax.experimental import pallas as pl
from jax.experimental.pallas import tpu as pltpu


def _round_up(a, b):
    return (a + b - 1) // b * b


def _vmem_limit_bytes():
    # Leave headroom below the physical per-core VMEM (review: never request
    # the full 64 MiB on v7x; ~96 MiB is fine on v5e/v6e's 128 MiB).
    try:
        cap = pltpu.get_tpu_info().vmem_capacity_bytes
    except Exception:
        cap = 128 * 1024 * 1024
    return int(min(cap - cap // 4, 96 * 1024 * 1024))


def _outer_cols(a, b):
    # (E,1) x (E,1) -> (E,E), result[i,j] = a[i,0]*b[j,0] (length-1 MXU
    # contraction); avoids any in-kernel transpose for row/col broadcasting.
    return lax.dot_general(a, b, (((1,), (1,)), ((), ())),
                           preferred_element_type=jnp.float32)


def _outer_rows(a, b):
    # (1,E) x (1,E) -> (E,E), result[i,j] = a[0,i]*b[0,j].
    return lax.dot_general(a, b, (((0,), (0,)), ((), ())),
                           preferred_element_type=jnp.float32)


# ----------------------------------------------------------------------------
# Kernel 1: router logits (T_pad, H) @ (H, E_pad) -> f32 logits, WITH the
# logit-COLUMN Gram fused in (streamed over T tiles, finalized at the last).
#   cos[i,j] = g_ij / (max(||c_i||,1e-8) * max(||c_j||,1e-8))
#   l2[i,j]  = sqrt(max(||c_i||^2 + ||c_j||^2 - 2 g_ij, 0))
# The Gram stays f32 (emulated MXU passes are cheap at E_pad=128 vs. H).
# ----------------------------------------------------------------------------
def _router_kernel(x_ref, w_ref, logits_ref, cos_ref, l2_ref, gram_ref, sq_ref):
    t = pl.program_id(0)

    @pl.when(t == 0)
    def _():
        gram_ref[...] = jnp.zeros_like(gram_ref)
        sq_ref[...] = jnp.zeros_like(sq_ref)

    l = jnp.dot(x_ref[...], w_ref[...],
                preferred_element_type=jnp.float32)               # (tT, Ep) f32
    logits_ref[...] = l
    gram_ref[...] += lax.dot_general(l, l, (((0,), (0,)), ((), ())),
                                     preferred_element_type=jnp.float32)
    sq_ref[...] += jnp.sum(l * l, axis=0, keepdims=True)          # (1, Ep)

    @pl.when(t == pl.num_programs(0) - 1)
    def _():
        gram = gram_ref[...]
        sq = sq_ref[...]
        n = jnp.sqrt(jnp.maximum(sq, 0.0))
        nc = jnp.maximum(n, 1e-8)                  # F.cosine_similarity eps
        cos_ref[...] = gram / _outer_rows(nc, nc)
        ones = jnp.ones_like(sq)
        ssum = _outer_rows(sq, ones) + _outer_rows(ones, sq)
        l2_ref[...] = jnp.sqrt(jnp.maximum(ssum - 2.0 * gram, 0.0))


def router_logits_pallas(x_bf16, w_router_pad, *, block_t):
    T_pad, H = x_bf16.shape
    E_pad = w_router_pad.shape[1]
    nT = T_pad // block_t
    return pl.pallas_call(
        _router_kernel,
        out_shape=(jax.ShapeDtypeStruct((T_pad, E_pad), jnp.float32),
                   jax.ShapeDtypeStruct((E_pad, E_pad), jnp.float32),
                   jax.ShapeDtypeStruct((E_pad, E_pad), jnp.float32)),
        grid=(nT,),
        in_specs=[pl.BlockSpec((block_t, H), lambda t: (t, 0)),
                  pl.BlockSpec((H, E_pad), lambda t: (0, 0))],
        out_specs=(pl.BlockSpec((block_t, E_pad), lambda t: (t, 0)),
                   pl.BlockSpec((E_pad, E_pad), lambda t: (0, 0)),
                   pl.BlockSpec((E_pad, E_pad), lambda t: (0, 0))),
        scratch_shapes=[pltpu.VMEM((E_pad, E_pad), jnp.float32),
                        pltpu.VMEM((1, E_pad), jnp.float32)],
        compiler_params=pltpu.CompilerParams(
            # T carries the fused Gram accumulation -> serial.
            dimension_semantics=("arbitrary",)),
    )(x_bf16, w_router_pad)


# ----------------------------------------------------------------------------
# Kernel 2: per-expert SiLU-gated MLP scaled by the per-token routing weight
# (0 if the token did not select this expert), grid = (T_tiles, E), WITH the
# centered/normalized expert-output Gram fused in.
#   - final_hidden_states accumulates across the E axis (resident f32 block).
#   - the current T-tile's scaled outputs for all experts are staged only in
#     VMEM (E, block_t, H) bf16; at e == E-1 the (E,E) Gram, row sums and row
#     squared sums are streamed into resident f32 scratch (no HBM round trip).
#   - at the last (t, e) step the Gram is mean-centered algebraically,
#     L2-normalized and turned into cosine / L2 matrices.
# TODO(synk): token-gather grouped matmul (PrefetchScalarGridSpec with group
# offsets) would cut MXU FLOPs by E/top_k once memory traffic is no longer
# the bottleneck.
# TODO(synk): on v7x, split experts across the 2 TensorCores (partial (T,H)
# accumulators + a host-side add) instead of running single-core.
# ----------------------------------------------------------------------------
def _moe_kernel(x_ref, wg_ref, wu_ref, wd_ref, wtok_ref,
                final_ref, cos_ref, l2_ref,
                stage_ref, gram_ref, rsum_ref, rsq_ref,
                *, n_true, block_t):
    t = pl.program_id(0)
    e = pl.program_id(1)
    n_t = pl.num_programs(0)
    n_e = pl.num_programs(1)

    @pl.when((t == 0) & (e == 0))
    def _():
        gram_ref[...] = jnp.zeros_like(gram_ref)
        rsum_ref[...] = jnp.zeros_like(rsum_ref)
        rsq_ref[...] = jnp.zeros_like(rsq_ref)

    @pl.when(e == 0)
    def _():
        final_ref[...] = jnp.zeros_like(final_ref)

    x = x_ref[...]                                                # (tT, H) bf16
    g = jnp.dot(x, wg_ref[0], preferred_element_type=jnp.float32)    # (tT, I)
    u = jnp.dot(x, wu_ref[0], preferred_element_type=jnp.float32)    # (tT, I)
    h = (g * jax.nn.sigmoid(g)) * u                               # SiLU gate f32
    y = jnp.dot(h.astype(jnp.bfloat16), wd_ref[0],
                preferred_element_type=jnp.float32)               # (tT, H) f32
    ys = y * wtok_ref[0]                                          # (tT, H) f32
    final_ref[...] += ys
    stage_ref[e] = ys.astype(stage_ref.dtype)                     # VMEM stage

    @pl.when(e == n_e - 1)
    def _():
        v = stage_ref[...]                                        # (E, tT, H) bf16
        if hasattr(pltpu, "einshape"):
            vt = pltpu.einshape("eth->teh", v)                    # (tT, E, H)
            gt = lax.dot_general(vt, vt, (((2,), (2,)), ((0,), (0,))),
                                 preferred_element_type=jnp.float32)  # (tT,E,E)
            gram_ref[...] += jnp.sum(gt, axis=0)
        else:
            # TODO(synk): static per-token unroll fallback (einshape missing);
            # fine for small block_t, avoid for block_t >> 64.
            acc = jnp.zeros(gram_ref.shape, gram_ref.dtype)
            for ti in range(block_t):
                yt = v[:, ti, :]                                  # (E, H)
                acc = acc + lax.dot_general(
                    yt, yt, (((1,), (1,)), ((), ())),
                    preferred_element_type=jnp.float32)
            gram_ref[...] += acc
        v32 = v.astype(jnp.float32)
        rsum_ref[...] += jnp.sum(jnp.sum(v32, axis=2), axis=1, keepdims=True)
        rsq_ref[...] += jnp.sum(jnp.sum(v32 * v32, axis=2), axis=1,
                                keepdims=True)

        @pl.when(t == n_t - 1)
        def _():
            gram = gram_ref[...]                                  # (E, E)
            s = rsum_ref[...]                                     # (E, 1)
            sq = rsq_ref[...]                                     # (E, 1)
            inv_n = 1.0 / float(n_true)
            gram_c = gram - _outer_cols(s, s) * inv_n             # centered Gram
            sq_c = jnp.maximum(sq - s * s * inv_n, 0.0)           # ||v_i-m_i||^2
            n_c = jnp.sqrt(sq_c)
            d = jnp.maximum(n_c, 1e-12)                           # F.normalize
            u_n = n_c / d                                         # ||u_i|| (<=1)
            a = d * jnp.maximum(u_n, 1e-8)                        # cosine clamp
            cos_ref[...] = gram_c / _outer_cols(a, a)
            gram_u = gram_c / _outer_cols(d, d)                   # u_i . u_j
            ones = jnp.ones_like(u_n)
            usq = u_n * u_n
            d2 = _outer_cols(usq, ones) + _outer_cols(ones, usq) - 2.0 * gram_u
            l2_ref[...] = jnp.sqrt(jnp.maximum(d2, 0.0))


def moe_experts_pallas(x_bf16, wg, wu, wd, wtok_e, *, block_t, n_true):
    T_pad, H = x_bf16.shape
    E, _, I = wg.shape
    nT = T_pad // block_t
    kern = functools.partial(_moe_kernel, n_true=n_true, block_t=block_t)
    return pl.pallas_call(
        kern,
        out_shape=(jax.ShapeDtypeStruct((T_pad, H), jnp.float32),
                   jax.ShapeDtypeStruct((E, E), jnp.float32),
                   jax.ShapeDtypeStruct((E, E), jnp.float32)),
        grid=(nT, E),
        in_specs=[pl.BlockSpec((block_t, H), lambda t, e: (t, 0)),
                  pl.BlockSpec((1, H, I), lambda t, e: (e, 0, 0)),
                  pl.BlockSpec((1, H, I), lambda t, e: (e, 0, 0)),
                  pl.BlockSpec((1, I, H), lambda t, e: (e, 0, 0)),
                  pl.BlockSpec((1, block_t, 1), lambda t, e: (e, t, 0))],
        out_specs=(pl.BlockSpec((block_t, H), lambda t, e: (t, 0)),
                   pl.BlockSpec((E, E), lambda t, e: (0, 0)),
                   pl.BlockSpec((E, E), lambda t, e: (0, 0))),
        scratch_shapes=[pltpu.VMEM((E, block_t, H), jnp.bfloat16),
                        pltpu.VMEM((E, E), jnp.float32),
                        pltpu.VMEM((E, 1), jnp.float32),
                        pltpu.VMEM((E, 1), jnp.float32)],
        compiler_params=pltpu.CompilerParams(
            # Both axes carry accumulations (T: fused Gram, E: final output).
            dimension_semantics=("arbitrary", "arbitrary"),
            vmem_limit_bytes=_vmem_limit_bytes()),
    )(x_bf16, wg, wu, wd, wtok_e)


# ----------------------------------------------------------------------------
# Full forward + hook statistics (what the PyTorch hook computes per layer).
# ----------------------------------------------------------------------------
def olmoe_similarity_forward(hidden_states, params, *, top_k, norm_topk_prob,
                             block_t=256):
    """hidden_states: (B, S, H) f32.  Returns (final_hidden_states,
    router_logits, stats) reproducing the forward-hook semantics."""
    B, S, H = hidden_states.shape
    T = B * S
    E = params["w_router"].shape[1]

    # bf16 sublane packing = 16 rows; E lane-padded to 128.  Production note:
    # block_t is VMEM-bounded by the (E, block_t, H) fused stage
    # (~64 on v7x, 128-256 on v5e/v6e).
    block_t = _round_up(max(16, min(block_t, _round_up(T, 16))), 16)
    T_pad = _round_up(T, block_t)
    E_pad = _round_up(E, 128)

    x = hidden_states.reshape(T, H).astype(jnp.float32)
    x_pad = jnp.pad(x, ((0, T_pad - T), (0, 0)))
    x_bf16 = x_pad.astype(jnp.bfloat16)
    w_router_pad = jnp.pad(params["w_router"],
                           ((0, 0), (0, E_pad - E))).astype(jnp.bfloat16)

    # -- router logits with the logit-column Gram fused in -------------------
    logits_pad, lcos_pad, ll2_pad = router_logits_pallas(
        x_bf16, w_router_pad, block_t=block_t)
    router_logits = logits_pad[:T, :E]
    logits_cos = lcos_pad[:E, :E]
    logits_l2 = ll2_pad[:E, :E]

    # routing glue (softmax / top-k / scatter bookkeeping), matches the hook
    routing_all = jax.nn.softmax(router_logits, axis=1)
    routing_weights, selected_experts = lax.top_k(routing_all, top_k)
    if norm_topk_prob:
        routing_weights = routing_weights / jnp.sum(
            routing_weights, axis=-1, keepdims=True)
    onehot = jax.nn.one_hot(selected_experts, E, dtype=jnp.float32)  # (T,K,E)
    wtok = jnp.einsum("tk,tke->te", routing_weights, onehot)         # (T,E)

    expert_counts = jnp.sum((jnp.sum(onehot, axis=1) > 0).astype(jnp.float32),
                            axis=0)
    expert_weights_sum = jnp.sum(wtok, axis=0)

    # -- expert MLPs + fused centered/normalized output similarity ----------
    wtok_pad = jnp.pad(wtok, ((0, T_pad - T), (0, 0)))
    wtok_e = jnp.transpose(wtok_pad).reshape(E, T_pad, 1)            # (E,T,1)
    final_pad, out_cos, out_l2 = moe_experts_pallas(
        x_bf16,
        params["w_gate"].astype(jnp.bfloat16),
        params["w_up"].astype(jnp.bfloat16),
        params["w_down"].astype(jnp.bfloat16),
        wtok_e, block_t=block_t, n_true=T * H)
    final_hidden_states = final_pad[:T].reshape(B, S, H)

    stats = {
        "expert_counts": expert_counts,
        "expert_weights_sum": expert_weights_sum,
        "router_logits_similarity": {"cosine": logits_cos, "l2": logits_l2},
        "expert_output_similarity": {"cosine": out_cos, "l2": out_l2},
        "router_logits_similarity_count": 1,
        "expert_output_similarity_count": 1,
    }
    return final_hidden_states, router_logits, stats


# ----------------------------------------------------------------------------
# Main
# ----------------------------------------------------------------------------
if __name__ == "__main__":
    B, S, H = 2, 16, 128       # batch, seq, hidden (H multiple of 128 lanes)
    E, I, K = 8, 128, 2        # num_experts, intermediate, top_k
    norm_topk_prob = False     # OLMoE default

    key = jax.random.PRNGKey(0)
    k_x, k_r, k_g, k_u, k_d = jax.random.split(key, 5)
    hidden_states = jax.random.normal(k_x, (B, S, H), dtype=jnp.float32)
    params = {
        "w_router": 0.05 * jax.random.normal(k_r, (H, E), dtype=jnp.float32),
        "w_gate":   0.05 * jax.random.normal(k_g, (E, H, I), dtype=jnp.float32),
        "w_up":     0.05 * jax.random.normal(k_u, (E, H, I), dtype=jnp.float32),
        "w_down":   0.05 * jax.random.normal(k_d, (E, I, H), dtype=jnp.float32),
    }

    # block_t=16 -> 2 token tiles, exercising the streamed Gram accumulation.
    final, logits, stats = olmoe_similarity_forward(
        hidden_states, params, top_k=K, norm_topk_prob=norm_topk_prob,
        block_t=16)
    jax.block_until_ready((final, logits, stats))

    # ---------------- pure-JAX reference (same bf16/f32 recipe) -------------
    T = B * S
    x = hidden_states.reshape(T, H)
    xb = x.astype(jnp.bfloat16)
    wrb = params["w_router"].astype(jnp.bfloat16)
    ref_logits = jnp.dot(xb, wrb, preferred_element_type=jnp.float32)
    assert jnp.allclose(logits, ref_logits, atol=2e-3), "router logits mismatch"

    probs = jax.nn.softmax(logits, axis=1)     # same logits -> same selection
    w_top, sel = lax.top_k(probs, K)
    wtok_chk = jnp.einsum("tk,tke->te", w_top,
                          jax.nn.one_hot(sel, E, dtype=jnp.float32))
    g = jnp.einsum("th,ehi->eti", xb, params["w_gate"].astype(jnp.bfloat16),
                   preferred_element_type=jnp.float32)
    u = jnp.einsum("th,ehi->eti", xb, params["w_up"].astype(jnp.bfloat16),
                   preferred_element_type=jnp.float32)
    h = (g * jax.nn.sigmoid(g)) * u
    y = jnp.einsum("eti,eih->eth", h.astype(jnp.bfloat16),
                   params["w_down"].astype(jnp.bfloat16),
                   preferred_element_type=jnp.float32)
    y_scaled = y * jnp.transpose(wtok_chk)[:, :, None]            # (E,T,H)
    ref_final = jnp.sum(y_scaled, axis=0).reshape(B, S, H)
    assert jnp.allclose(final, ref_final, atol=1e-2), "moe output mismatch"

    # router-logit column similarity reference
    lg = ref_logits
    gram = lg.T @ lg
    sq = jnp.sum(lg * lg, axis=0)
    nrm = jnp.sqrt(sq)
    cos_ref = gram / (jnp.maximum(nrm[:, None], 1e-8) *
                      jnp.maximum(nrm[None, :], 1e-8))
    l2_ref = jnp.linalg.norm(lg[:, :, None] - lg[:, None, :], axis=0)
    assert jnp.allclose(stats["router_logits_similarity"]["cosine"], cos_ref,
                        atol=2e-2), "logits cosine mismatch"
    assert jnp.allclose(stats["router_logits_similarity"]["l2"], l2_ref,
                        atol=2e-2), "logits l2 mismatch"

    # expert-output similarity reference (bf16 outputs, centered + normalized)
    eo = y_scaled.astype(jnp.bfloat16).astype(jnp.float32).reshape(E, T * H)
    ec = eo - jnp.mean(eo, axis=1, keepdims=True)
    en = jnp.linalg.norm(ec, axis=1, keepdims=True)
    un = ec / jnp.maximum(en, 1e-12)
    cos_o_ref = un @ un.T
    l2_o_ref = jnp.linalg.norm(un[:, None, :] - un[None, :, :], axis=-1)
    assert jnp.allclose(stats["expert_output_similarity"]["cosine"], cos_o_ref,
                        atol=2e-2), "expert-output cosine mismatch"
    assert jnp.allclose(stats["expert_output_similarity"]["l2"], l2_o_ref,
                        atol=2e-2), "expert-output l2 mismatch"

    assert stats["router_logits_similarity"]["cosine"].shape == (E, E)
    assert stats["expert_output_similarity"]["l2"].shape == (E, E)

    print("KERNEL_OK")
</pallas_src>

<mosaic_0001>
module attributes {stable_mosaic.version = 11 : i64} {
  func.func @_router_kernel(%arg0: i32, %arg1: memref<16x128xbf16, #tpu.memory_space<vmem>>, %arg2: memref<128x128xbf16, #tpu.memory_space<vmem>>, %arg3: memref<16x128xf32, #tpu.memory_space<vmem>>, %arg4: memref<128x128xf32, #tpu.memory_space<vmem>>, %arg5: memref<128x128xf32, #tpu.memory_space<vmem>>, %arg6: memref<128x128xf32, #tpu.memory_space<vmem>>, %arg7: memref<1x128xf32, #tpu.memory_space<vmem>>) attributes {dimension_semantics = [#tpu.dimension_semantics<arbitrary>], iteration_bounds = array<i64: 2>, scalar_prefetch = 0 : i64, scratch_operands = 2 : i64, tpu.core_type = #tpu.core_type<tc>, window_params = [{transform_indices = @transform_0, window_bounds = array<i64: 16, 128>}, {pipeline_mode = #tpu.pipeline_mode<synchronous>, transform_indices = @transform_1, window_bounds = array<i64: 128, 128>}, {transform_indices = @transform_2, window_bounds = array<i64: 16, 128>}, {pipeline_mode = #tpu.pipeline_mode<synchronous>, transform_indices = @transform_3, window_bounds = array<i64: 128, 128>}, {pipeline_mode = #tpu.pipeline_mode<synchronous>, transform_indices = @transform_4, window_bounds = array<i64: 128, 128>}]} {
    %c0_i32 = arith.constant 0 : i32
    %0 = arith.cmpi eq, %arg0, %c0_i32 : i32
    %1 = arith.extui %0 : i1 to i32
    %c0_i32_0 = arith.constant 0 : i32
    %2 = arith.cmpi ne, %1, %c0_i32_0 : i32
    scf.if %2 {
      %cst_17 = arith.constant 0.000000e+00 : f32
      %20 = vector.broadcast %cst_17 : f32 to vector<128x128xf32>
      %c0_18 = arith.constant 0 : index
      %c0_19 = arith.constant 0 : index
      %21 = vector.load %arg6[%c0_18, %c0_19] : memref<128x128xf32, #tpu.memory_space<vmem>>, vector<128x128xf32>
      tpu.vector_store %arg6[%c0_18, %c0_19], %20 {strides = array<i32>} : memref<128x128xf32, #tpu.memory_space<vmem>>, vector<128x128xf32>,
      %cst_20 = arith.constant 0.000000e+00 : f32
      %22 = vector.broadcast %cst_20 : f32 to vector<1x128xf32>
      %c0_21 = arith.constant 0 : index
      %c0_22 = arith.constant 0 : index
      %23 = vector.load %arg7[%c0_21, %c0_22] : memref<1x128xf32, #tpu.memory_space<vmem>>, vector<1x128xf32>
      tpu.vector_store %arg7[%c0_21, %c0_22], %22 {strides = array<i32>} : memref<1x128xf32, #tpu.memory_space<vmem>>, vector<1x128xf32>,
    } else {
    }
    %c0 = arith.constant 0 : index
    %c0_1 = arith.constant 0 : index
    %3 = vector.load %arg1[%c0, %c0_1] : memref<16x128xbf16, #tpu.memory_space<vmem>>, vector<16x128xbf16>
    %c0_2 = arith.constant 0 : index
    %c0_3 = arith.constant 0 : index
    %4 = vector.load %arg2[%c0_2, %c0_3] : memref<128x128xbf16, #tpu.memory_space<vmem>>, vector<128x128xbf16>
    %cst = arith.constant dense<0.000000e+00> : vector<16x128xf32>
    %5 = tpu.matmul %3, %4, %cst {dimension_numbers = #tpu.dot_dimension_numbers<[1], [0], [0], [1], [0, 0, 1, 1], [], []>} : vector<16x128xbf16>, vector<128x128xbf16>, vector<16x128xf32> -> vector<16x128xf32>
    %c0_4 = arith.constant 0 : index
    %c0_5 = arith.constant 0 : index
    %6 = vector.load %arg3[%c0_4, %c0_5] : memref<16x128xf32, #tpu.memory_space<vmem>>, vector<16x128xf32>
    tpu.vector_store %arg3[%c0_4, %c0_5], %5 {strides = array<i32>} : memref<16x128xf32, #tpu.memory_space<vmem>>, vector<16x128xf32>,
    %c0_6 = arith.constant 0 : index
    %c0_7 = arith.constant 0 : index
    %7 = vector.load %arg6[%c0_6, %c0_7] : memref<128x128xf32, #tpu.memory_space<vmem>>, vector<128x128xf32>
    %cst_8 = arith.constant dense<0.000000e+00> : vector<128x128xf32>
    %8 = tpu.matmul %5, %5, %cst_8 {dimension_numbers = #tpu.dot_dimension_numbers<[0], [0], [1], [1], [0, 1, 1, 1], [], []>} : vector<16x128xf32>, vector<16x128xf32>, vector<128x128xf32> -> vector<128x128xf32>
    %9 = arith.addf %7, %8 : vector<128x128xf32>
    %c0_9 = arith.constant 0 : index
    %c0_10 = arith.constant 0 : index
    %10 = vector.load %arg6[%c0_9, %c0_10] : memref<128x128xf32, #tpu.memory_space<vmem>>, vector<128x128xf32>
    tpu.vector_store %arg6[%c0_9, %c0_10], %9 {strides = array<i32>} : memref<128x128xf32, #tpu.memory_space<vmem>>, vector<128x128xf32>,
    %c0_11 = arith.constant 0 : index
    %c0_12 = arith.constant 0 : index
    %11 = vector.load %arg7[%c0_11, %c0_12] : memref<1x128xf32, #tpu.memory_space<vmem>>, vector<1x128xf32>
    %12 = arith.mulf %5, %5 : vector<16x128xf32>
    %cst_13 = arith.constant dense<0.000000e+00> : vector<128xf32>
    %13 = vector.multi_reduction <add>, %12, %cst_13 [0] : vector<16x128xf32> to vector<128xf32>
    %14 = vector.shape_cast %13 : vector<128xf32> to vector<1x128xf32>
    %15 = arith.addf %11, %14 : vector<1x128xf32>
    %c0_14 = arith.constant 0 : index
    %c0_15 = arith.constant 0 : index
    %16 = vector.load %arg7[%c0_14, %c0_15] : memref<1x128xf32, #tpu.memory_space<vmem>>, vector<1x128xf32>
    tpu.vector_store %arg7[%c0_14, %c0_15], %15 {strides = array<i32>} : memref<1x128xf32, #tpu.memory_space<vmem>>, vector<1x128xf32>,
    %c1_i32 = arith.constant 1 : i32
    %17 = arith.cmpi eq, %arg0, %c1_i32 : i32
    %18 = arith.extui %17 : i1 to i32
    %c0_i32_16 = arith.constant 0 : i32
    %19 = arith.cmpi ne, %18, %c0_i32_16 : i32
    scf.if %19 {
      %c0_17 = arith.constant 0 : index
      %c0_18 = arith.constant 0 : index
      %20 = vector.load %arg6[%c0_17, %c0_18] : memref<128x128xf32, #tpu.memory_space<vmem>>, vector<128x128xf32>
      %c0_19 = arith.constant 0 : index
      %c0_20 = arith.constant 0 : index
      %21 = vector.load %arg7[%c0_19, %c0_20] : memref<1x128xf32, #tpu.memory_space<vmem>>, vector<1x128xf32>
      %cst_21 = arith.constant 0.000000e+00 : f32
      %22 = vector.broadcast %cst_21 : f32 to vector<1x128xf32>
      %23 = arith.maximumf %21, %22 : vector<1x128xf32>
      %24 = math.sqrt %23 : vector<1x128xf32>
      %cst_22 = arith.constant 9.99999993E-9 : f32
      %25 = vector.broadcast %cst_22 : f32 to vector<1x128xf32>
      %26 = arith.maximumf %24, %25 : vector<1x128xf32>
      %cst_23 = arith.constant dense<0.000000e+00> : vector<128x128xf32>
      %27 = tpu.matmul %26, %26, %cst_23 {dimension_numbers = #tpu.dot_dimension_numbers<[0], [0], [1], [1], [0, 1, 1, 1], [], []>} : vector<1x128xf32>, vector<1x128xf32>, vector<128x128xf32> -> vector<128x128xf32>
      %28 = arith.divf %20, %27 : vector<128x128xf32>
      %c0_24 = arith.constant 0 : index
      %c0_25 = arith.constant 0 : index
      %29 = vector.load %arg4[%c0_24, %c0_25] : memref<128x128xf32, #tpu.memory_space<vmem>>, vector<128x128xf32>
      tpu.vector_store %arg4[%c0_24, %c0_25], %28 {strides = array<i32>} : memref<128x128xf32, #tpu.memory_space<vmem>>, vector<128x128xf32>,
      %cst_26 = arith.constant 1.000000e+00 : f32
      %30 = vector.broadcast %cst_26 : f32 to vector<1x128xf32>
      %cst_27 = arith.constant dense<0.000000e+00> : vector<128x128xf32>
      %31 = tpu.matmul %21, %30, %cst_27 {dimension_numbers = #tpu.dot_dimension_numbers<[0], [0], [1], [1], [0, 1, 1, 1], [], []>} : vector<1x128xf32>, vector<1x128xf32>, vector<128x128xf32> -> vector<128x128xf32>
      %cst_28 = arith.constant dense<0.000000e+00> : vector<128x128xf32>
      %32 = tpu.matmul %30, %21, %cst_28 {dimension_numbers = #tpu.dot_dimension_numbers<[0], [0], [1], [1], [0, 1, 1, 1], [], []>} : vector<1x128xf32>, vector<1x128xf32>, vector<128x128xf32> -> vector<128x128xf32>
      %33 = arith.addf %31, %32 : vector<128x128xf32>
      %cst_29 = arith.constant 2.000000e+00 : f32
      %34 = vector.broadcast %cst_29 : f32 to vector<128x128xf32>
      %35 = arith.mulf %34, %20 : vector<128x128xf32>
      %36 = arith.subf %33, %35 : vector<128x128xf32>
      %cst_30 = arith.constant 0.000000e+00 : f32
      %37 = vector.broadcast %cst_30 : f32 to vector<128x128xf32>
      %38 = arith.maximumf %36, %37 : vector<128x128xf32>
      %39 = math.sqrt %38 : vector<128x128xf32>
      %c0_31 = arith.constant 0 : index
      %c0_32 = arith.constant 0 : index
      %40 = vector.load %arg5[%c0_31, %c0_32] : memref<128x128xf32, #tpu.memory_space<vmem>>, vector<128x128xf32>
      tpu.vector_store %arg5[%c0_31, %c0_32], %39 {strides = array<i32>} : memref<128x128xf32, #tpu.memory_space<vmem>>, vector<128x128xf32>,
    } else {
    }
    return
  }
  func.func @transform_0(%arg0: i32) -> (i32, i32) {
    %c0_i32 = arith.constant 0 : i32
    %c0_i32_0 = arith.constant 0 : i32
    return %arg0, %c0_i32 : i32, i32
  }
  func.func @transform_1(%arg0: i32) -> (i32, i32) {
    %c0_i32 = arith.constant 0 : i32
    %c0_i32_0 = arith.constant 0 : i32
    %c0_i32_1 = arith.constant 0 : i32
    return %c0_i32, %c0_i32_0 : i32, i32
  }
  func.func @transform_2(%arg0: i32) -> (i32, i32) {
    %c0_i32 = arith.constant 0 : i32
    %c0_i32_0 = arith.constant 0 : i32
    return %arg0, %c0_i32 : i32, i32
  }
  func.func @transform_3(%arg0: i32) -> (i32, i32) {
    %c0_i32 = arith.constant 0 : i32
    %c0_i32_0 = arith.constant 0 : i32
    %c0_i32_1 = arith.constant 0 : i32
    return %c0_i32, %c0_i32_0 : i32, i32
  }
  func.func @transform_4(%arg0: i32) -> (i32, i32) {
    %c0_i32 = arith.constant 0 : i32
    %c0_i32_0 = arith.constant 0 : i32
    %c0_i32_1 = arith.constant 0 : i32
    return %c0_i32, %c0_i32_0 : i32, i32
  }
}

</mosaic_0001>

<bundles_post_ra>
// kernel: tpu_custom_call.1
= control target key start
LH: loop header
LB: loop body
LE: loop exit
PB: predicated region body
PF: predicated region fallthrough
CT: control target
= control target key end

     0   :  { %10 = vsyncpa [#allocation5], 0  ;;  %s2843_s0 = inlined_call_operand.hbm [shape: bf16[32,128], index: 0, kind: input, shape index: {}]   ;;  %s2844_s1 = inlined_call_operand.hbm [shape: bf16[128,128], index: 1, kind: input, shape index: {}]   ;;  %s2845_s2 = inlined_call_operand.hbm [shape: f32[32,128], index: 2, kind: output, shape index: {0}]   ;;  %s2846_s3 = inlined_call_operand.hbm [shape: f32[128,128], index: 3, kind: output, shape index: {1}]   ;;  %s2847_s4 = inlined_call_operand.hbm [shape: f32[128,128], index: 4, kind: output, shape index: {2}]  }
   0x1   :  { %12 = vsyncpa [#allocation5 + $0x1], 0 }
   0x2   :  { %13 = vsyncpa [#allocation8], 0 }
   0x3   :  { %14 = vsyncpa [#allocation6], 0 }
   0x4   :  { %16 = vsyncpa [#allocation6 + $0x1], 0 }
   0x5   :  { %17 = vsyncpa [#allocation11], 0  ;;  %s2411_s15 = smov 0   ;;  %s2413_s16 = smov 0  }
   0x6   :  { %s2415_s17 = smov 0   ;;  %s2417_s18 = smov 0  }
   0x7 LB: > { %s2432_s19 = sadd.s32 4294967295, %s2371_s18   ;;  %s1736_s20 = sadd.s32 4294967294, %s2371_s18   ;;  %s2371_s18 = sphi %s2417_s18, %s2876_s18   ;;  %s2367_s17 = sphi %s2415_s17, %s2875_s17   ;;  %s2363_s16 = sphi %s2413_s16, %s2874_s16   ;;  %s2359_s15 = sphi %s2411_s15, %s2873_s15  }
   0x8   : > { %p43_p0 = scmp.ne.s32.totalorder %s2363_s16, %s2359_s15  ;;  %p2848_p1 = scmp.eq.s32.totalorder %s2432_s19, 0 }
   0x9   : > { %p94_p3 = scmp.eq.s32.totalorder %s1736_s20, 1  ;;  %p1737_p5 = scmp.ge.s32.totalorder %s2371_s18, 1 }
   0xa   : > { %p2441_p4 = por %p2848_p1, %p43_p0  ;;  %p143_p7 = scmp.lt.s32.totalorder %s2371_s18, 3 }
   0xb   : > { %p2446_p6 = por %p94_p3, %p43_p0  ;;  %s2373_s24 = smov [#allocation7]  }
   0xc   : > { %s2852_s21 = scalar_select %p2441_p4, 1, 0 }
   0xd   : > { %s2853_s22 = scalar_select %p2446_p6, 1, 0 }
   0xe   : > { %p2452_p9 = pnand %p1737_p5, %p143_p7  ;;  %s155_s25 = sshll.u32 %s2373_s24, 4  ;;  %s156_s25 = int_to_ptr.vmem [resolvable:$true] %s155_s25 }
   0xf   : > { %s2466_s27 = sadd.s32 1, %s2371_s18   ;;  %s30_s28 = sadd.s32 1, %s2367_s17 }
  0x10   : > { %s2854_s23 = scalar_select %p2452_p9, 1, 0 }
  0x11   : > { %p2058_p10 = pneg %p2452_p9  ;;  %s27_s29 = ssub.s32 %s2371_s18, %s2466_s27 }
  0x12   : > { %s2208_s30 = scalar_lea.vmem %s156_s25, 1024  ;;  %p2216_p7 = scmp.lt.s32.totalorder %s156_s25, %s156_s25 }
  0x13   : > { %p2461_p12 = pnand %p2058_p10, %p2848_p1  ;;  %p2209_p0 = scmp.ne.s32.totalorder %s156_s25, %s2208_s30 }
  0x14   : > { %p2217_p8 = scmp.lt.s32.totalorder %s2208_s30, %s2208_s30 }
  0x15   : > { %p2199_p13 = pneg %p2461_p12 }
  0x16   : > { %p2218_p11 = por %p2217_p8, %p2216_p7 }
  0x17   : > { %p2211_p3 = pnand %p2209_p0, %p2199_p13 }
  0x19   : > { %p2212_p5 = pneg %p2211_p3 }
  0x1b   : > { %p2219_p2 = pnand %p2218_p11, %p2212_p5 }
  0x1d   : > { %2222 = shalt.err (!%p2219_p2)
}
  0x1e   : > { %s2374_s5 = smov 64   ;;  %s2375_s6 = smov 4  }
  0x1f   : > { %2061 = dma.hbm_to_vmem [thread:$0]  (!%p2461_p12), %s2844_s1, 1024, %s156_s25, [#allocation8], %s2374_s5, %s2374_s5, %s2375_s6  }
  0x20   : > { %p28_p2 = scmp.eq.s32.totalorder %s27_s29, 0  ;;  %p37_p8 = scmp.ne.s32.totalorder %s2367_s17, %s2363_s16 }
  0x21   : > { %p38_p10 = scmp.eq.s32.totalorder %s2371_s18, 0  ;;  %p2071_p11 = scmp.lt.s32.totalorder %s2371_s18, 2 }
  0x22   : > { %s2486_s9 = scalar_select %p28_p2, %s2367_s17, %s30_s28  }
  0x23   : > { %p39_p13 = por %p38_p10, %p37_p8  ;;  %p2856_p0 = scmp.eq.s32.totalorder %s2432_s19, 1 }
  0x24   : > { %s169_s11 = sand.u32 1, %s2367_s17   ;;  %s1834_s12 = sshll.u32 %s2371_s18, 7 }
  0x25   : > { %p2490_p3 = por %p2856_p0, %p37_p8  ;;  %s1740_s13 = sshll.u32 %s169_s11, 3 }
  0x26   : > { %s2499_s24 = scalar_lea.hbm %s2843_s0, %s1834_s12  ;;  %s173_s25 = scalar_lea.vmem [#allocation4], %s1740_s13 }
  0x27   : > { %s2857_s10 = scalar_select %p2490_p3, 1, 0 }
  0x28   : > { %s180_s26 = sshll.u32 %s173_s25, 4  ;;  %p2501_p12 = pnand %p2071_p11, %p39_p13  ;;  %s2505_s26 = int_to_ptr.vmem [resolvable:$true] %s180_s26 }
  0x29   : > { %s2507_s29 = scalar_lea.sflag [#allocation5], %s169_s11  ;;  %s2223_s30 = scalar_lea.hbm %s2499_s24, 128 }
  0x2a   : > { %p2224_p5 = scmp.ne.s32.totalorder %s2499_s24, %s2223_s30  ;;  %p2225_p7 = pneg %p2501_p12 }
  0x2b   : > { %s2228_s12 = scalar_lea.hbm %s2843_s0, 256  ;;  %p2229_p10 = scmp.lt.s32.totalorder %s2499_s24, %s2843_s0 }
  0x2c   : > { %p2226_p2 = pnand %p2225_p7, %p2224_p5  ;;  %p2230_p11 = scmp.lt.s32.totalorder %s2228_s12, %s2223_s30 }
  0x2e   : > { %p2227_p8 = pneg %p2226_p2  ;;  %p2231_p13 = por %p2230_p11, %p2229_p10 }
  0x30   : > { %p2232_p0 = pnand %p2231_p13, %p2227_p8 }
  0x32   : > { %2235 = shalt.err (!%p2232_p0)
}
  0x33   : > { %s2236_s11 = scalar_lea.vmem %s2505_s26, 128  ;;  %s2376_s20 = smov [#allocation4]  }
  0x34   : > { %p2237_p1 = scmp.ne.s32.totalorder %s2505_s26, %s2236_s11  ;;  %s2241_s25 = sshll.u32 %s2376_s20, 4  ;;  %s2242_s25 = int_to_ptr.vmem [resolvable:$false] %s2241_s25 }
  0x35   : > { %s2243_s7 = scalar_lea.vmem %s2242_s25, 256  ;;  %p2244_p2 = scmp.lt.s32.totalorder %s2505_s26, %s2242_s25 }
  0x36   : > { %p2239_p6 = pnand %p2237_p1, %p2225_p7  ;;  %p2245_p3 = scmp.lt.s32.totalorder %s2243_s7, %s2236_s11 }
  0x38   : > { %p2240_p5 = pneg %p2239_p6  ;;  %p2246_p4 = por %p2245_p3, %p2244_p2 }
  0x3a   : > { %p2247_p9 = pnand %p2246_p4, %p2240_p5 }
  0x3c   : > { %2250 = shalt.err (!%p2247_p9)
}
  0x3d   : > { %2065 = dma.hbm_to_vmem [thread:$0]  (!%p2501_p12), %s2499_s24, 128, %s2505_s26, %s2507_s29, %s2374_s5, %s2374_s5, %s2375_s6  }
  0x3e   : > { %p2859_p1 = scmp.ne.s32.totalorder %s2854_s23, 0 }
  0x3f   : > { %s2534_s30 = sand.u32 (!%p2859_p1), 1, %s2363_s16   ;;  %p2860_p4 = scmp.ne.s32.totalorder (!%p2859_p1), %s2852_s21, 0 }
  0x40   : > { %192 = sbr.rel (%p2859_p1) target bundleno = 1247 (0x4df), region = 28  ;;  %s1744_s8 = sshll.u32 (!%p2859_p1), %s2534_s30, 3 }
  0x41   : > { %s195_s12 = scalar_lea.sflag (!%p2859_p1), [#allocation5], %s2534_s30  ;;  %s2538_s13 = scalar_lea.vmem (!%p2859_p1), [#allocation4], %s1744_s8 }
  0x45   : > { %2342 = dma.done.wait (%p2860_p4), %s195_s12, 128  }
  0x46   : > { %2344 = vsyncadd (%p2860_p4), %s195_s12, 4294967168  ;;  %p2861_p6 = scmp.eq.s32.totalorder %s2432_s19, 0 }
  0x48   : > { %2346 = dma.done.wait (%p2861_p6), [#allocation8], 1024   ;;  %p2862_p9 = pmov %p2861_p6 }
  0x49   : > { %s1746_s23 = sshll.u32 %s2534_s30, 4  ;;  %p2863_p3 = scmp.ne.s32.totalorder %s2432_s19, 0 }
  0x4a   : > { %2348 = vsyncadd (%p2862_p9), [#allocation8], 4294966272  ;;  %s2549_s5 = scalar_lea.vmem [#allocation9], %s1746_s23 }
  0x4b   : > { %233 = sbr.rel (%p2863_p3) target bundleno = 90 (0x5a), region = 40 }
  0x50   : > { %v2377_v0 = vmov 0.0  }
  0x51   : > { %234 = vst [vmem:[#allocation2 + $0x30] sm:$0xff] %v2377_v0  ;;  %235 = vst [vmem:[#allocation2] sm:$0xff] %v2377_v0 }
  0x52   : > { %236 = vst [vmem:[#allocation2 + $0x58] sm:$0xff] %v2377_v0  ;;  %237 = vst [vmem:[#allocation2 + $0x18] sm:$0xff] %v2377_v0 }
  0x53   : > { %238 = vst [vmem:[#allocation2 + $0x50] sm:$0xff] %v2377_v0  ;;  %239 = vst [vmem:[#allocation2 + $0x68] sm:$0xff] %v2377_v0 }
  0x54   : > { %240 = vst [vmem:[#allocation2 + $0x8] sm:$0xff] %v2377_v0  ;;  %241 = vst [vmem:[#allocation2 + $0x48] sm:$0xff] %v2377_v0 }
  0x55   : > { %242 = vst [vmem:[#allocation2 + $0x40] sm:$0xff] %v2377_v0  ;;  %243 = vst [vmem:[#allocation2 + $0x20] sm:$0xff] %v2377_v0 }
  0x56   : > { %244 = vst [vmem:[#allocation2 + $0x10] sm:$0xff] %v2377_v0  ;;  %245 = vst [vmem:[#allocation2 + $0x38] sm:$0xff] %v2377_v0 }
  0x57   : > { %246 = vst [vmem:[#allocation2 + $0x60] sm:$0xff] %v2377_v0  ;;  %247 = vst [vmem:[#allocation2 + $0x70] sm:$0xff] %v2377_v0 }
  0x58   : > { %248 = vst [vmem:[#allocation2 + $0x78] sm:$0xff] %v2377_v0  ;;  %249 = vst [vmem:[#allocation2 + $0x28] sm:$0xff] %v2377_v0 }
  0x59   : > { %250 = vst [vmem:[#allocation3] sm:$0x1] %v2377_v0 }
  0x5a PF: > { %v2122_v1 = vld [vmem:[#allocation7 + $0x38] sm:$0xff]   ;;  %v2378_v2 = vmov 0.0   ;;  %v2123_v3 = vld [vmem:[#allocation7 + $0x30] sm:$0xff]   ;;  %vm2379_vm0 = vmmov 0   ;;  %v2124_v4 = vld [vmem:[#allocation7 + $0x28] sm:$0xff]   ;;  %vm414_vm1 = vcmask 130048  }
  0x5b   : > { %1914 = vmatprep.subr.bf16.mxu0 %v2378_v2  ;;  %1930 = vmatprep.mubr.msk.bf16.mxu0 %vm2379_vm0, %v2378_v2  ;;  %v2125_v5 = vld [vmem:[#allocation7 + $0x20] sm:$0xff]   ;;  %v2126_v6 = vld [vmem:[#allocation7 + $0x18] sm:$0xff]   ;;  %v2127_v7 = vld [vmem:[#allocation7 + $0x10] sm:$0xff]   ;;  %p1773_p12 = scmp.ne.s32.totalorder %s2432_s19, 1 }
  0x5c   : > { %1915 = vmatpush3.bf16.msra.mxu0 %v2122_v1  ;;  %v2128_v8 = vld [vmem:[#allocation7 + $0x8] sm:$0xff]   ;;  %v2129_v9 = vld [vmem:[#allocation7] sm:$0xff]   ;;  %v2130_v10 = vld [vmem:[%s2538_s13] sm:$0xff]  }
  0x5d   : > { %1916 = vmatprep.subr.bf16.mxu0 %v2378_v2  ;;  %v367_v42 = vld [vmem:[#allocation2] sm:$0xff]  ;;  %v366_v44 = vld [vmem:[#allocation2 + $0x30] sm:$0xff]  ;;  %v369_v48 = vld [vmem:[#allocation2 + $0x18] sm:$0xff] }
  0x5e   : > { %v368_v50 = vld [vmem:[#allocation2 + $0x58] sm:$0xff]  ;;  %v371_v54 = vld [vmem:[#allocation2 + $0x68] sm:$0xff]  ;;  %v370_v56 = vld [vmem:[#allocation2 + $0x50] sm:$0xff] }
  0x5f   : > { %v373_v60 = vld [vmem:[#allocation2 + $0x48] sm:$0xff] }
  0x60   : > { %1917 = vmatpush3.bf16.msra.mxu0 %v2123_v3  ;;  %v640_v23 = vld [vmem:[#allocation3] sm:$0x1]  ;;  %v372_v62 = vld [vmem:[#allocation2 + $0x8] sm:$0xff] }
  0x61   : > { %1918 = vmatprep.subr.bf16.mxu0 %v2378_v2 }
  0x64   : > { %1919 = vmatpush3.bf16.msra.mxu0 %v2124_v4  ;;  %v374_v4 = vld [vmem:[#allocation2 + $0x40] sm:$0xff] }
  0x65   : > { %1920 = vmatprep.subr.bf16.mxu0 %v2378_v2 }
  0x68   : > { %1921 = vmatpush3.bf16.msra.mxu0 %v2125_v5 }
  0x69   : > { %1922 = vmatprep.subr.bf16.mxu0 %v2378_v2 }
  0x6c   : > { %1923 = vmatpush3.bf16.msra.mxu0 %v2126_v6 }
  0x6d   : > { %1924 = vmatprep.subr.bf16.mxu0 %v2378_v2 }
  0x70   : > { %1925 = vmatpush3.bf16.msra.mxu0 %v2127_v7 }
  0x71   : > { %1926 = vmatprep.subr.bf16.mxu0 %v2378_v2 }
  0x74   : > { %1927 = vmatpush3.bf16.msra.mxu0 %v2128_v8  ;;  %v377_v8 = vld [vmem:[#allocation2 + $0x38] sm:$0xff] }
  0x75   : > { %1928 = vmatprep.subr.bf16.mxu0 %v2378_v2  ;;  %v375_v2 = vld [vmem:[#allocation2 + $0x20] sm:$0xff] }
  0x78   : > { %1929 = vmatpush3.bf16.msra.mxu0 %v2129_v9 }
  0x7b   : > { %1931 = vmatmul.mubr.bf16.vlgmr.msra.gmra.mxu0 %v2130_v10  ;;  %v376_v10 = vld [vmem:[#allocation2 + $0x10] sm:$0xff] }
 0x13b   : > { %v357_v11 = vpop.f32.mrf.mxu0 }
 0x13c   : > { %364 = vst [vmem:[%s2549_s5] sm:$0xff] %v357_v11  ;;  %382 = vxpose.xlu0.b32.start [1/2] (short) %v357_v11, 128  ;;  %v641_v14 = vmul.f32 %v357_v11, %v357_v11 }
 0x13d   : > { %v1932_v12 = vpop.f32.mrf.mxu0 }
 0x13f   : > { %v360_v13 = vpop.f32.mrf.mxu0 }
 0x140   : > { %365 = vst [vmem:[%s2549_s5 + $0x8] sm:$0xff] %v360_v13  ;;  %v642_v15 = vmul.f32 %v360_v13, %v360_v13  ;;  %383 = vxpose.xlu0.b32.end [2/2] (short) %v360_v13, 128  ;;  %1934 = vmatprep.subr.mxu1 %v360_v13 }
 0x141   : > { %v1933_v16 = vpop.f32.mrf.mxu0  ;;  %1935 = vmatpush3.msra.mxu1 %v360_v13 }
 0x142   : > { %v643_v17 = vadd.f32 %v642_v15, %v641_v14  ;;  %1936 = vmatprep.subr.mxu1 %v357_v11  ;;  %v379_v14 = vld [vmem:[#allocation2 + $0x70] sm:$0xff]  ;;  %v378_v16 = vld [vmem:[#allocation2 + $0x60] sm:$0xff] }
 0x143   : > { %1937 = vmatpush3.msra.mxu1 %v357_v11 }
 0x144   : > { %v644_v18 = vrot.slane %v643_v17, 4 }
 0x146   : > { %v645_v19 = vadd.f32 %v644_v18, %v643_v17 }
 0x148   : > { %v646_v20 = vrot.slane %v645_v19, 2 }
 0x14a   : > { %v647_v21 = vadd.f32 %v646_v20, %v645_v19  ;;  %v381_v20 = vld [vmem:[#allocation2 + $0x28] sm:$0xff] }
 0x14c   : > { %v648_v22 = vrot.slane %v647_v21, 1 }
 0x14e   : > { %v649_v24 = vadd.f32 %v648_v22, %v647_v21  ;;  %v380_v22 = vld [vmem:[#allocation2 + $0x78] sm:$0xff] }
 0x150   : > { %v650_v25 = vadd.f32 %v649_v24, %v640_v23 }
 0x152   : > { %651 = vst [vmem:[#allocation3] sm:$0x1] %v650_v25 }
 0x1b8   : > { %v398_v26 = vpop.trf.xlu0 }
 0x1b9   : > { %1938 = vmatprep.mubr.msk.f32.mxu1 %vm414_vm1, %v398_v26 }
 0x1bc   : > { %v399_v27 = vpop.trf.xlu0 }
 0x1bd   : > { %1939 = vmatmul.mubr.msk.f32.vlgmr.msra.gmra.mxu1 %vm414_vm1, %v399_v27 }
 0x1c0   : > { %v400_v28 = vpop.trf.xlu0 }
 0x1c1   : > { %1941 = vmatprep.mubr.msk.f32.mxu1 %vm414_vm1, %v400_v28 }
 0x1c4   : > { %v401_v29 = vpop.trf.xlu0 }
 0x1c5   : > { %1942 = vmatmul.mubr.msk.f32.gmra.mxu1 %vm414_vm1, %v401_v29 }
 0x1c8   : > { %v402_v30 = vpop.trf.xlu0 }
 0x1c9   : > { %1944 = vmatprep.mubr.msk.f32.mxu1 %vm414_vm1, %v402_v30 }
 0x1cc   : > { %v403_v31 = vpop.trf.xlu0 }
 0x1cd   : > { %1945 = vmatmul.mubr.msk.f32.gmra.mxu1 %vm414_vm1, %v403_v31 }
 0x1d0   : > { %v404_v32 = vpop.trf.xlu0 }
 0x1d1   : > { %1947 = vmatprep.mubr.msk.f32.mxu1 %vm414_vm1, %v404_v32 }
 0x1d4   : > { %v405_v33 = vpop.trf.xlu0 }
 0x1d5   : > { %1948 = vmatmul.mubr.msk.f32.gmra.mxu1 %vm414_vm1, %v405_v33 }
 0x1d8   : > { %v406_v34 = vpop.trf.xlu0 }
 0x1d9   : > { %1950 = vmatprep.mubr.msk.f32.mxu1 %vm414_vm1, %v406_v34 }
 0x1dc   : > { %v407_v35 = vpop.trf.xlu0 }
 0x1dd   : > { %1951 = vmatmul.mubr.msk.f32.gmra.mxu1 %vm414_vm1, %v407_v35 }
 0x1e0   : > { %v408_v36 = vpop.trf.xlu0 }
 0x1e1   : > { %1953 = vmatprep.mubr.msk.f32.mxu1 %vm414_vm1, %v408_v36 }
 0x1e4   : > { %v409_v37 = vpop.trf.xlu0 }
 0x1e5   : > { %1954 = vmatmul.mubr.msk.f32.gmra.mxu1 %vm414_vm1, %v409_v37 }
 0x1e8   : > { %v410_v38 = vpop.trf.xlu0 }
 0x1e9   : > { %1956 = vmatprep.mubr.msk.f32.mxu1 %vm414_vm1, %v410_v38 }
 0x1ec   : > { %v411_v39 = vpop.trf.xlu0 }
 0x1ed   : > { %1957 = vmatmul.mubr.msk.f32.gmra.mxu1 %vm414_vm1, %v411_v39 }
 0x1f0   : > { %v412_v40 = vpop.trf.xlu0 }
 0x1f1   : > { %1959 = vmatprep.mubr.msk.f32.mxu1 %vm414_vm1, %v412_v40 }
 0x1f4   : > { %v413_v41 = vpop.trf.xlu0 }
 0x1f5   : > { %1960 = vmatmul.mubr.msk.f32.gmra.mxu1 %vm414_vm1, %v413_v41 }
 0x27d   : > { %v1940_v43 = vpop.f32.mrf.mxu1 }
 0x27e   : > { %v609_v45 = vadd.f32 %v1940_v43, %v367_v42 }
 0x27f   : > { %v529_v46 = vpop.f32.mrf.mxu1 }
 0x280   : > { %625 = vst [vmem:[#allocation2] sm:$0xff] %v609_v45  ;;  %v608_v47 = vadd.f32 %v529_v46, %v366_v44 }
 0x282   : > { %624 = vst [vmem:[#allocation2 + $0x30] sm:$0xff] %v608_v47 }
 0x285   : > { %v1943_v49 = vpop.f32.mrf.mxu1 }
 0x286   : > { %v611_v51 = vadd.f32 %v1943_v49, %v369_v48 }
 0x287   : > { %v539_v52 = vpop.f32.mrf.mxu1 }
 0x288   : > { %627 = vst [vmem:[#allocation2 + $0x18] sm:$0xff] %v611_v51  ;;  %v610_v53 = vadd.f32 %v539_v52, %v368_v50 }
 0x28a   : > { %626 = vst [vmem:[#allocation2 + $0x58] sm:$0xff] %v610_v53 }
 0x28d   : > { %v1946_v55 = vpop.f32.mrf.mxu1 }
 0x28e   : > { %v613_v57 = vadd.f32 %v1946_v55, %v371_v54 }
 0x28f   : > { %v549_v58 = vpop.f32.mrf.mxu1 }
 0x290   : > { %629 = vst [vmem:[#allocation2 + $0x68] sm:$0xff] %v613_v57  ;;  %v612_v59 = vadd.f32 %v549_v58, %v370_v56 }
 0x292   : > { %628 = vst [vmem:[#allocation2 + $0x50] sm:$0xff] %v612_v59 }
 0x295   : > { %v1949_v61 = vpop.f32.mrf.mxu1 }
 0x296   : > { %v615_v63 = vadd.f32 %v1949_v61, %v373_v60 }
 0x297   : > { %v559_v0 = vpop.f32.mrf.mxu1 }
 0x298   : > { %631 = vst [vmem:[#allocation2 + $0x48] sm:$0xff] %v615_v63  ;;  %v614_v1 = vadd.f32 %v559_v0, %v372_v62 }
 0x29a   : > { %630 = vst [vmem:[#allocation2 + $0x8] sm:$0xff] %v614_v1 }
 0x29d   : > { %v1952_v3 = vpop.f32.mrf.mxu1 }
 0x29e   : > { %v617_v5 = vadd.f32 %v1952_v3, %v375_v2 }
 0x29f   : > { %v569_v6 = vpop.f32.mrf.mxu1 }
 0x2a0   : > { %633 = vst [vmem:[#allocation2 + $0x20] sm:$0xff] %v617_v5  ;;  %v616_v7 = vadd.f32 %v569_v6, %v374_v4 }
 0x2a2   : > { %632 = vst [vmem:[#allocation2 + $0x40] sm:$0xff] %v616_v7 }
 0x2a5   : > { %v1955_v9 = vpop.f32.mrf.mxu1 }
 0x2a6   : > { %v619_v11 = vadd.f32 %v1955_v9, %v377_v8 }
 0x2a7   : > { %v579_v12 = vpop.f32.mrf.mxu1 }
 0x2a8   : > { %635 = vst [vmem:[#allocation2 + $0x38] sm:$0xff] %v619_v11  ;;  %v618_v13 = vadd.f32 %v579_v12, %v376_v10 }
 0x2aa   : > { %634 = vst [vmem:[#allocation2 + $0x10] sm:$0xff] %v618_v13 }
 0x2ad   : > { %v1958_v15 = vpop.f32.mrf.mxu1 }
 0x2ae   : > { %v621_v17 = vadd.f32 %v1958_v15, %v379_v14 }
 0x2af   : > { %v589_v18 = vpop.f32.mrf.mxu1 }
 0x2b0   : > { %637 = vst [vmem:[#allocation2 + $0x70] sm:$0xff] %v621_v17  ;;  %v620_v19 = vadd.f32 %v589_v18, %v378_v16 }
 0x2b2   : > { %636 = vst [vmem:[#allocation2 + $0x60] sm:$0xff] %v620_v19 }
 0x2b5   : > { %v1961_v21 = vpop.f32.mrf.mxu1 }
 0x2b6   : > { %v623_v23 = vadd.f32 %v1961_v21, %v381_v20  ;;  %655 = sbr.rel (%p1773_p12) target bundleno = 1191 (0x4a7), region = 44 }
 0x2b7   : > { %v599_v24 = vpop.f32.mrf.mxu1 }
 0x2b8   : > { %639 = vst [vmem:[#allocation2 + $0x28] sm:$0xff] %v623_v23  ;;  %v622_v25 = vadd.f32 %v599_v24, %v380_v22 }
 0x2ba   : > { %638 = vst [vmem:[#allocation2 + $0x78] sm:$0xff] %v622_v25 }
 0x2bb   : > { %v672_v26 = vld [vmem:[#allocation3] sm:$0x1]  ;;  %vm763_vm4 = vcmask 1040384   ;;  %v2380_v34 = vmov 1.0   ;;  %vm714_vm5 = vcmask 7168   ;;  %v2631_v25 = vld [vmem:[#allocation2 + $0x30] sm:$0xff] }
 0x2bc   : > { %v673_v27 = vmax.f32 %v672_v26, 0.0  ;;  %1188 = vxpose.xlu1.b32.start.end [1/1] (short) %v672_v26, 128  ;;  %v2629_v23 = vld [vmem:[#allocation2] sm:$0xff] }
 0x2be   : > { %2131 = vrsqrt.f32 %v673_v27  ;;  %vm676_vm2 = vcmp.eq.f32.partialorder %v673_v27, inf  ;;  %v679_v29 = vand.u32 2147483648, %v673_v27  ;;  %vm678_vm3 = vcmp.eq.f32.partialorder %v673_v27, 0.0 }
 0x2cb   : > { %v2132_v28 = vpop.eup %2131 }
 0x2cc   : > { %v675_v30 = vmul.f32 %v2132_v28, %v673_v27 }
 0x2ce   : > { %v677_v31 = vsel %vm676_vm2, %v673_v27, %v675_v30 }
 0x2cf   : > { %v680_v32 = vsel %vm678_vm3, %v679_v29, %v677_v31  ;;  %v2635_v31 = vld [vmem:[#allocation2 + $0x18] sm:$0xff] }
 0x2d0   : > { %v681_v33 = vmax.f32 %v680_v32, 1e-08 }
 0x2d2   : > { %682 = vxpose.xlu0.b32.start.end [1/1] (short) %v681_v33, 128  ;;  %1962 = vmatprep.subr.msk.mxu0 %vm763_vm4, %v681_v33 }
 0x2d3   : > { %1963 = vmatpush3.msk.msra.mxu0 %vm763_vm4, %v681_v33  ;;  %2040 = vmatprep.subr.msk.mxu1 %vm763_vm4, %v681_v33 }
 0x2d4   : > { %2041 = vmatpush3.msk.msra.mxu1 %vm763_vm4, %v681_v33  ;;  %2014 = vmatprep.subr.msk.mxu0 %vm763_vm4, %v2380_v34  ;;  %v2637_v33 = vld [vmem:[#allocation2 + $0x58] sm:$0xff] }
 0x2d5   : > { %1988 = vmatprep.subr.msk.mxu1 %vm763_vm4, %v672_v26 }
 0x30f   : > { %960 = vxpose.xlu0.b32.start.end [1/1] (short) %v2380_v34, 128 }
 0x338   : > { %v1204_v35 = vpop.trf.xlu1 }
 0x33c   : > { %v1205_v36 = vpop.trf.xlu1 }
 0x340   : > { %v1206_v37 = vpop.trf.xlu1 }
 0x344   : > { %v1207_v38 = vpop.trf.xlu1 }
 0x348   : > { %v1208_v39 = vpop.trf.xlu1 }
 0x34c   : > { %v1209_v40 = vpop.trf.xlu1 }
 0x34e   : > { %v698_v41 = vpop.trf.xlu0 }
 0x34f   : > { %1964 = vmatprep.mubr.msk.f32.mxu0 %vm714_vm5, %v698_v41  ;;  %v2643_v41 = vld [vmem:[#allocation2 + $0x50] sm:$0xff] }
 0x350   : > { %v1210_v43 = vpop.trf.xlu1 }
 0x352   : > { %v699_v42 = vpop.trf.xlu0 }
 0x353   : > { %1965 = vmatmul.mubr.msk.f32.vlgmr.msra.gmra.mxu0 %vm714_vm5, %v699_v42 }
 0x354   : > { %2015 = vmatpush3.msk.msra.mxu0 %vm763_vm4, %v2380_v34  ;;  %v1211_v45 = vpop.trf.xlu1 }
 0x356   : > { %v700_v44 = vpop.trf.xlu0 }
 0x357   : > { %1967 = vmatprep.mubr.msk.f32.mxu0 %vm714_vm5, %v700_v44 }
 0x358   : > { %v1212_v48 = vpop.trf.xlu1 }
 0x35a   : > { %v701_v46 = vpop.trf.xlu0 }
 0x35b   : > { %1968 = vmatmul.mubr.msk.f32.gmra.mxu0 %vm714_vm5, %v701_v46 }
 0x35c   : > { %v1213_v50 = vpop.trf.xlu1 }
 0x35e   : > { %v702_v47 = vpop.trf.xlu0 }
 0x35f   : > { %1970 = vmatprep.mubr.msk.f32.mxu0 %vm714_vm5, %v702_v47  ;;  %v2647_v47 = vld [vmem:[#allocation2 + $0x48] sm:$0xff] }
 0x360   : > { %v1214_v53 = vpop.trf.xlu1 }
 0x362   : > { %v703_v49 = vpop.trf.xlu0 }
 0x363   : > { %1971 = vmatmul.mubr.msk.f32.gmra.mxu0 %vm714_vm5, %v703_v49  ;;  %v2649_v49 = vld [vmem:[#allocation2 + $0x8] sm:$0xff] }
 0x364   : > { %v1215_v55 = vpop.trf.xlu1 }
 0x366   : > { %v704_v51 = vpop.trf.xlu0 }
 0x367   : > { %1973 = vmatprep.mubr.msk.f32.mxu0 %vm714_vm5, %v704_v51 }
 0x368   : > { %v1216_v58 = vpop.trf.xlu1 }
 0x36a   : > { %v705_v52 = vpop.trf.xlu0 }
 0x36b   : > { %1974 = vmatmul.mubr.msk.f32.gmra.mxu0 %vm714_vm5, %v705_v52 }
 0x36c   : > { %2016 = vmatprep.mubr.msk.f32.mxu0 %vm714_vm5, %v1204_v35  ;;  %v1217_v60 = vpop.trf.xlu1 }
 0x36e   : > { %v706_v54 = vpop.trf.xlu0 }
 0x36f   : > { %1976 = vmatprep.mubr.msk.f32.mxu1 %vm714_vm5, %v706_v54  ;;  %2017 = vmatmul.mubr.msk.f32.vlgmr.msra.gmra.mxu0 %vm714_vm5, %v1205_v36 }
 0x370   : > { %2019 = vmatprep.mubr.msk.f32.mxu0 %vm714_vm5, %v1206_v37  ;;  %v1218_v63 = vpop.trf.xlu1 }
 0x372   : > { %v707_v56 = vpop.trf.xlu0 }
 0x373   : > { %1977 = vmatmul.mubr.msk.f32.vlgmr.msra.gmra.mxu1 %vm714_vm5, %v707_v56  ;;  %2020 = vmatmul.mubr.msk.f32.gmra.mxu0 %vm714_vm5, %v1207_v38 }
 0x374   : > { %1989 = vmatpush3.msk.msra.mxu1 %vm763_vm4, %v672_v26  ;;  %2022 = vmatprep.mubr.msk.f32.mxu0 %vm714_vm5, %v1208_v39  ;;  %v1219_v1 = vpop.trf.xlu1  ;;  %v2641_v39 = vld [vmem:[#allocation2 + $0x68] sm:$0xff] }
 0x376   : > { %v708_v57 = vpop.trf.xlu0 }
 0x377   : > { %1979 = vmatprep.mubr.msk.f32.mxu1 %vm714_vm5, %v708_v57  ;;  %2023 = vmatmul.mubr.msk.f32.gmra.mxu0 %vm714_vm5, %v1209_v40  ;;  %v2655_v57 = vld [vmem:[#allocation2 + $0x40] sm:$0xff] }
 0x378   : > { %2025 = vmatprep.mubr.msk.f32.mxu0 %vm714_vm5, %v1210_v43 }
 0x37a   : > { %v709_v59 = vpop.trf.xlu0 }
 0x37b   : > { %1980 = vmatmul.mubr.msk.f32.gmra.mxu1 %vm714_vm5, %v709_v59  ;;  %2026 = vmatmul.mubr.msk.f32.gmra.mxu0 %vm714_vm5, %v1211_v45 }
 0x37c   : > { %2028 = vmatprep.mubr.msk.f32.mxu0 %vm714_vm5, %v1212_v48 }
 0x37e   : > { %v710_v61 = vpop.trf.xlu0 }
 0x37f   : > { %1982 = vmatprep.mubr.msk.f32.mxu1 %vm714_vm5, %v710_v61  ;;  %2029 = vmatmul.mubr.msk.f32.gmra.mxu0 %vm714_vm5, %v1213_v50 }
 0x380   : > { %2031 = vmatprep.mubr.msk.f32.mxu0 %vm714_vm5, %v1214_v53 }
 0x382   : > { %v711_v62 = vpop.trf.xlu0 }
 0x383   : > { %1983 = vmatmul.mubr.msk.f32.gmra.mxu1 %vm714_vm5, %v711_v62  ;;  %2032 = vmatmul.mubr.msk.f32.gmra.mxu0 %vm714_vm5, %v1215_v55  ;;  %v2653_v55 = vld [vmem:[#allocation2 + $0x20] sm:$0xff] }
 0x384   : > { %2034 = vmatprep.mubr.msk.f32.mxu0 %vm714_vm5, %v1216_v58 }
 0x386   : > { %v712_v0 = vpop.trf.xlu0 }
 0x387   : > { %1985 = vmatprep.mubr.msk.f32.mxu1 %vm714_vm5, %v712_v0  ;;  %2035 = vmatmul.mubr.msk.f32.gmra.mxu0 %vm714_vm5, %v1217_v60 }
 0x388   : > { %2037 = vmatprep.mubr.msk.f32.mxu0 %vm714_vm5, %v1218_v63  ;;  %v2659_v63 = vld [vmem:[#allocation2 + $0x38] sm:$0xff] }
 0x38a   : > { %v713_v2 = vpop.trf.xlu0 }
 0x38b   : > { %1986 = vmatmul.mubr.msk.f32.gmra.mxu1 %vm714_vm5, %v713_v2  ;;  %2038 = vmatmul.mubr.msk.f32.gmra.mxu0 %vm714_vm5, %v1219_v1  ;;  %v2661_v1 = vld [vmem:[#allocation2 + $0x10] sm:$0xff] }
 0x38e   : > { %v976_v3 = vpop.trf.xlu0 }
 0x38f   : > { %1990 = vmatprep.mubr.msk.f32.mxu1 %vm714_vm5, %v976_v3 }
 0x392   : > { %v977_v4 = vpop.trf.xlu0 }
 0x393   : > { %1991 = vmatmul.mubr.msk.f32.vlgmr.msra.gmra.mxu1 %vm714_vm5, %v977_v4 }
 0x396   : > { %v978_v5 = vpop.trf.xlu0 }
 0x397   : > { %1993 = vmatprep.mubr.msk.f32.mxu1 %vm714_vm5, %v978_v5 }
 0x39a   : > { %v979_v6 = vpop.trf.xlu0 }
 0x39b   : > { %1994 = vmatmul.mubr.msk.f32.gmra.mxu1 %vm714_vm5, %v979_v6 }
 0x39e   : > { %v980_v7 = vpop.trf.xlu0 }
 0x39f   : > { %1996 = vmatprep.mubr.msk.f32.mxu1 %vm714_vm5, %v980_v7  ;;  %v2665_v7 = vld [vmem:[#allocation2 + $0x70] sm:$0xff] }
 0x3a2   : > { %v981_v8 = vpop.trf.xlu0 }
 0x3a3   : > { %1997 = vmatmul.mubr.msk.f32.gmra.mxu1 %vm714_vm5, %v981_v8 }
 0x3a6   : > { %v982_v9 = vpop.trf.xlu0 }
 0x3a7   : > { %1999 = vmatprep.mubr.msk.f32.mxu1 %vm714_vm5, %v982_v9 }
 0x3aa   : > { %v983_v10 = vpop.trf.xlu0 }
 0x3ab   : > { %2000 = vmatmul.mubr.msk.f32.gmra.mxu1 %vm714_vm5, %v983_v10  ;;  %v2667_v10 = vld [vmem:[#allocation2 + $0x60] sm:$0xff] }
 0x3ae   : > { %v984_v11 = vpop.trf.xlu0 }
 0x3af   : > { %2002 = vmatprep.mubr.msk.f32.mxu1 %vm714_vm5, %v984_v11  ;;  %v1417_v11 = vmul.f32 2.0, %v2629_v23 }
 0x3b2   : > { %v985_v12 = vpop.trf.xlu0 }
 0x3b3   : > { %2003 = vmatmul.mubr.msk.f32.gmra.mxu1 %vm714_vm5, %v985_v12 }
 0x3b6   : > { %v986_v13 = vpop.trf.xlu0 }
 0x3b7   : > { %2005 = vmatprep.mubr.msk.f32.mxu1 %vm714_vm5, %v986_v13 }
 0x3ba   : > { %v987_v14 = vpop.trf.xlu0 }
 0x3bb   : > { %2006 = vmatmul.mubr.msk.f32.gmra.mxu1 %vm714_vm5, %v987_v14 }
 0x3be   : > { %v988_v15 = vpop.trf.xlu0 }
 0x3bf   : > { %2008 = vmatprep.mubr.msk.f32.mxu1 %vm714_vm5, %v988_v15 }
 0x3c2   : > { %v989_v16 = vpop.trf.xlu0 }
 0x3c3   : > { %2009 = vmatmul.mubr.msk.f32.gmra.mxu1 %vm714_vm5, %v989_v16  ;;  %v1416_v16 = vmul.f32 2.0, %v2631_v25 }
 0x3c6   : > { %v990_v17 = vpop.trf.xlu0 }
 0x3c7   : > { %2011 = vmatprep.mubr.msk.f32.mxu1 %vm714_vm5, %v990_v17 }
 0x3ca   : > { %v991_v18 = vpop.trf.xlu0 }
 0x3cb   : > { %2012 = vmatmul.mubr.msk.f32.gmra.mxu1 %vm714_vm5, %v991_v18 }
 0x413   : > { %v1966_v19 = vpop.f32.mrf.mxu0 }
 0x414   : > { %2133 = vrcp.f32 %v1966_v19 }
 0x415   : > { %v833_v20 = vpop.f32.mrf.mxu0 }
 0x416   : > { %2135 = vrcp.f32 %v833_v20 }
 0x41b   : > { %v1969_v21 = vpop.f32.mrf.mxu0 }
 0x41c   : > { %2137 = vrcp.f32 %v1969_v21 }
 0x41d   : > { %v843_v22 = vpop.f32.mrf.mxu0 }
 0x41e   : > { %2139 = vrcp.f32 %v843_v22 }
 0x421   : > { %v2134_v24 = vpop.eup %2133 }
 0x422   : > { %v915_v26 = vmul.f32 %v2134_v24, %v2629_v23 }
 0x423   : > { %v2136_v27 = vpop.eup %2135  ;;  %v1972_v28 = vpop.f32.mrf.mxu0 }
 0x424   : > { %2141 = vrcp.f32 %v1972_v28  ;;  %945 = vst [vmem:[#allocation10 + $0x8] sm:$0xff] %v915_v26  ;;  %v913_v29 = vmul.f32 %v2136_v27, %v2631_v25  ;;  %v2673_v26 = vld [vmem:[#allocation2 + $0x28] sm:$0xff]  ;;  %v2675_v28 = vld [vmem:[#allocation2 + $0x78] sm:$0xff] }
 0x425   : > { %v853_v30 = vpop.f32.mrf.mxu0 }
 0x426   : > { %2143 = vrcp.f32 %v853_v30  ;;  %944 = vst [vmem:[#allocation10] sm:$0xff] %v913_v29  ;;  %v1419_v29 = vmul.f32 2.0, %v2635_v31 }
 0x429   : > { %v2138_v32 = vpop.eup %2137 }
 0x42a   : > { %v919_v34 = vmul.f32 %v2138_v32, %v2635_v31 }
 0x42b   : > { %v2140_v35 = vpop.eup %2139  ;;  %v1975_v36 = vpop.f32.mrf.mxu0 }
 0x42c   : > { %2145 = vrcp.f32 %v1975_v36  ;;  %947 = vst [vmem:[#allocation10 + $0x18] sm:$0xff] %v919_v34  ;;  %v917_v37 = vmul.f32 %v2140_v35, %v2637_v33  ;;  %v1418_v36 = vmul.f32 2.0, %v2637_v33  ;;  %v1420_v33 = vmul.f32 2.0, %v2643_v41 }
 0x42d   : > { %v863_v38 = vpop.f32.mrf.mxu0 }
 0x42e   : > { %2147 = vrcp.f32 %v863_v38  ;;  %946 = vst [vmem:[#allocation10 + $0x10] sm:$0xff] %v917_v37 }
 0x42f   : > { %v2018_v9 = vpop.f32.mrf.mxu0 }
 0x431   : > { %v2142_v40 = vpop.eup %2141  ;;  %v1337_v18 = vpop.f32.mrf.mxu0 }
 0x432   : > { %v923_v42 = vmul.f32 %v2142_v40, %v2641_v39 }
 0x433   : > { %v2144_v43 = vpop.eup %2143  ;;  %v1978_v44 = vpop.f32.mrf.mxu1 }
 0x434   : > { %2149 = vrcp.f32 %v1978_v44  ;;  %949 = vst [vmem:[#allocation10 + $0x28] sm:$0xff] %v923_v42  ;;  %v921_v45 = vmul.f32 %v2144_v43, %v2643_v41  ;;  %v2021_v27 = vpop.f32.mrf.mxu0  ;;  %v1423_v41 = vmul.f32 2.0, %v2647_v47 }
 0x435   : > { %v873_v46 = vpop.f32.mrf.mxu1 }
 0x436   : > { %2151 = vrcp.f32 %v873_v46  ;;  %948 = vst [vmem:[#allocation10 + $0x20] sm:$0xff] %v921_v45  ;;  %v1347_v38 = vpop.f32.mrf.mxu0  ;;  %v1421_v46 = vmul.f32 2.0, %v2641_v39 }
 0x438   : > { %v2024_v31 = vpop.f32.mrf.mxu0 }
 0x439   : > { %v2146_v48 = vpop.eup %2145 }
 0x43a   : > { %v927_v50 = vmul.f32 %v2146_v48, %v2647_v47 }
 0x43b   : > { %v2148_v51 = vpop.eup %2147  ;;  %v1981_v52 = vpop.f32.mrf.mxu1 }
 0x43c   : > { %2153 = vrcp.f32 %v1981_v52  ;;  %951 = vst [vmem:[#allocation10 + $0x38] sm:$0xff] %v927_v50  ;;  %v925_v53 = vmul.f32 %v2148_v51, %v2649_v49  ;;  %v1357_v52 = vpop.f32.mrf.mxu0 }
 0x43d   : > { %v883_v54 = vpop.f32.mrf.mxu1 }
 0x43e   : > { %2155 = vrcp.f32 %v883_v54  ;;  %950 = vst [vmem:[#allocation10 + $0x30] sm:$0xff] %v925_v53  ;;  %v2027_v39 = vpop.f32.mrf.mxu0 }
 0x441   : > { %v2150_v56 = vpop.eup %2149 }
 0x442   : > { %v931_v58 = vmul.f32 %v2150_v56, %v2653_v55 }
 0x443   : > { %v2152_v59 = vpop.eup %2151  ;;  %v1984_v60 = vpop.f32.mrf.mxu1 }
 0x444   : > { %2157 = vrcp.f32 %v1984_v60  ;;  %953 = vst [vmem:[#allocation10 + $0x48] sm:$0xff] %v931_v58  ;;  %v929_v61 = vmul.f32 %v2152_v59, %v2655_v57 }
 0x445   : > { %v893_v62 = vpop.f32.mrf.mxu1 }
 0x446   : > { %2159 = vrcp.f32 %v893_v62  ;;  %952 = vst [vmem:[#allocation10 + $0x40] sm:$0xff] %v929_v61 }
 0x449   : > { %v2154_v0 = vpop.eup %2153 }
 0x44a   : > { %v935_v2 = vmul.f32 %v2154_v0, %v2659_v63 }
 0x44b   : > { %v2156_v3 = vpop.eup %2155  ;;  %v1987_v4 = vpop.f32.mrf.mxu1 }
 0x44c   : > { %2161 = vrcp.f32 %v1987_v4  ;;  %955 = vst [vmem:[#allocation10 + $0x58] sm:$0xff] %v935_v2  ;;  %v933_v5 = vmul.f32 %v2156_v3, %v2661_v1 }
 0x44d   : > { %v903_v6 = vpop.f32.mrf.mxu1 }
 0x44e   : > { %2163 = vrcp.f32 %v903_v6  ;;  %954 = vst [vmem:[#allocation10 + $0x50] sm:$0xff] %v933_v5 }
 0x451   : > { %v2158_v8 = vpop.eup %2157 }
 0x452   : > { %v939_v12 = vmul.f32 %v2158_v8, %v2665_v7 }
 0x453   : > { %v2160_v13 = vpop.eup %2159  ;;  %v1992_v14 = vpop.f32.mrf.mxu1 }
 0x454   : > { %v1343_v15 = vadd.f32 %v2018_v9, %v1992_v14  ;;  %957 = vst [vmem:[#allocation10 + $0x68] sm:$0xff] %v939_v12  ;;  %v937_v17 = vmul.f32 %v2160_v13, %v2667_v10  ;;  %v1367_v13 = vpop.f32.mrf.mxu0 }
 0x455   : > { %v1109_v19 = vpop.f32.mrf.mxu1 }
 0x456   : > { %v1433_v20 = vsub.f32 %v1343_v15, %v1417_v11  ;;  %v1338_v21 = vadd.f32 %v1337_v18, %v1109_v19  ;;  %956 = vst [vmem:[#allocation10 + $0x60] sm:$0xff] %v937_v17  ;;  %v1422_v11 = vmul.f32 2.0, %v2649_v49 }
 0x458   : > { %v1449_v22 = vmax.f32 %v1433_v20, 0.0  ;;  %v1432_v24 = vsub.f32 %v1338_v21, %v1416_v16 }
 0x459   : > { %v2162_v23 = vpop.eup %2161 }
 0x45a   : > { %2165 = vrsqrt.f32 %v1449_v22  ;;  %v1448_v30 = vmax.f32 %v1432_v24, 0.0  ;;  %v943_v34 = vmul.f32 %v2162_v23, %v2673_v26  ;;  %vm1473_vm6 = vcmp.eq.f32.partialorder %v1449_v22, inf }
 0x45b   : > { %v2164_v25 = vpop.eup %2163  ;;  %v1995_v32 = vpop.f32.mrf.mxu1  ;;  %v1476_v62 = vand.u32 2147483648, %v1449_v22  ;;  %vm1475_vm7 = vcmp.eq.f32.partialorder %v1449_v22, 0.0  ;;  %v1425_v23 = vmul.f32 2.0, %v2653_v55 }
 0x45c   : > { %v1353_v35 = vadd.f32 %v2021_v27, %v1995_v32  ;;  %v941_v37 = vmul.f32 %v2164_v25, %v2675_v28  ;;  %2167 = vrsqrt.f32 %v1448_v30  ;;  %959 = vst [vmem:[#allocation10 + $0x78] sm:$0xff] %v943_v34  ;;  %vm1466_vm8 = vcmp.eq.f32.partialorder %v1448_v30, inf }
 0x45d   : > { %v1119_v40 = vpop.f32.mrf.mxu1  ;;  %v1469_v8 = vand.u32 2147483648, %v1448_v30  ;;  %vm1468_vm9 = vcmp.eq.f32.partialorder %v1448_v30, 0.0 }
 0x45e   : > { %v1435_v42 = vsub.f32 %v1353_v35, %v1419_v29  ;;  %v1348_v43 = vadd.f32 %v1347_v38, %v1119_v40  ;;  %958 = vst [vmem:[#allocation10 + $0x70] sm:$0xff] %v941_v37  ;;  %v1424_v35 = vmul.f32 2.0, %v2655_v57 }
 0x460   : > { %v1451_v44 = vmax.f32 %v1435_v42, 0.0  ;;  %v1434_v45 = vsub.f32 %v1348_v43, %v1418_v36 }
 0x462   : > { %2169 = vrsqrt.f32 %v1451_v44  ;;  %v2682_v48 = vmax.f32 %v1434_v45, 0.0  ;;  %vm1487_vm10 = vcmp.eq.f32.partialorder %v1451_v44, inf  ;;  %v1490_v21 = vand.u32 2147483648, %v1451_v44 }
 0x463   : > { %v1998_v50 = vpop.f32.mrf.mxu1  ;;  %vm1489_vm11 = vcmp.eq.f32.partialorder %v1451_v44, 0.0 }
 0x464   : > { %v1363_v51 = vadd.f32 %v2024_v31, %v1998_v50  ;;  %2171 = vrsqrt.f32 %v2682_v48  ;;  %vm1480_vm12 = vcmp.eq.f32.partialorder %v2682_v48, inf  ;;  %v1483_v32 = vand.u32 2147483648, %v2682_v48 }
 0x465   : > { %v1129_v53 = vpop.f32.mrf.mxu1  ;;  %vm1482_vm13 = vcmp.eq.f32.partialorder %v2682_v48, 0.0 }
 0x466   : > { %v1437_v54 = vsub.f32 %v1363_v51, %v1421_v46  ;;  %v1358_v56 = vadd.f32 %v1357_v52, %v1129_v53  ;;  %v1427_v51 = vmul.f32 2.0, %v2659_v63 }
 0x467   : > { %v2166_v58 = vpop.eup %2165 }
 0x468   : > { %v1472_v59 = vmul.f32 %v2166_v58, %v1449_v22  ;;  %v2686_v60 = vmax.f32 %v1437_v54, 0.0  ;;  %v1436_v61 = vsub.f32 %v1358_v56, %v1420_v33 }
 0x469   : > { %v2168_v0 = vpop.eup %2167 }
 0x46a   : > { %v1474_v2 = vsel %vm1473_vm6, %v1449_v22, %v1472_v59  ;;  %2173 = vrsqrt.f32 %v2686_v60  ;;  %v1465_v4 = vmul.f32 %v2168_v0, %v1448_v30  ;;  %v2690_v5 = vmax.f32 %v1436_v61, 0.0  ;;  %v2030_v22 = vpop.f32.mrf.mxu0 }
 0x46b   : > { %v1477_v3 = vsel %vm1475_vm7, %v1476_v62, %v1474_v2  ;;  %v2001_v6 = vpop.f32.mrf.mxu1  ;;  %vm1501_vm14 = vcmp.eq.f32.partialorder %v2686_v60, inf  ;;  %v1504_v57 = vand.u32 2147483648, %v2686_v60  ;;  %vm1503_vm15 = vcmp.eq.f32.partialorder %v2686_v60, 0.0 }
 0x46c   : > { %1577 = vst [vmem:[#allocation12 + $0x8] sm:$0xff] %v1477_v3  ;;  %v1373_v9 = vadd.f32 %v2027_v39, %v2001_v6  ;;  %v1467_v12 = vsel %vm1466_vm8, %v1448_v30, %v1465_v4  ;;  %2175 = vrsqrt.f32 %v2690_v5  ;;  %v1377_v55 = vpop.f32.mrf.mxu0  ;;  %vm1494_vm0 = vcmp.eq.f32.partialorder %v2690_v5, inf }
 0x46d   : > { %v1139_v14 = vpop.f32.mrf.mxu1  ;;  %v1470_v15 = vsel %vm1468_vm9, %v1469_v8, %v1467_v12  ;;  %v1497_v56 = vand.u32 2147483648, %v2690_v5  ;;  %v1426_v59 = vmul.f32 2.0, %v2661_v1  ;;  %vm1496_vm1 = vcmp.eq.f32.partialorder %v2690_v5, 0.0 }
 0x46e   : > { %v1439_v16 = vsub.f32 %v1373_v9, %v1423_v41  ;;  %v1368_v47 = vadd.f32 %v1367_v13, %v1139_v14  ;;  %1576 = vst [vmem:[#allocation12] sm:$0xff] %v1470_v15  ;;  %v2033_v46 = vpop.f32.mrf.mxu0  ;;  %v1429_v9 = vmul.f32 2.0, %v2665_v7 }
 0x46f   : > { %v2170_v17 = vpop.eup %2169 }
 0x470   : > { %v1486_v18 = vmul.f32 %v2170_v17, %v1451_v44  ;;  %v2694_v19 = vmax.f32 %v1439_v16, 0.0  ;;  %v1438_v20 = vsub.f32 %v1368_v47, %v1422_v11  ;;  %v1387_v63 = vpop.f32.mrf.mxu0  ;;  %v1428_v47 = vmul.f32 2.0, %v2667_v10 }
 0x471   : > { %v2172_v24 = vpop.eup %2171 }
 0x472   : > { %v1488_v49 = vsel %vm1487_vm10, %v1451_v44, %v1486_v18  ;;  %2177 = vrsqrt.f32 %v2694_v19  ;;  %v1479_v29 = vmul.f32 %v2172_v24, %v2682_v48  ;;  %v2699_v25 = vmax.f32 %v1438_v20, 0.0  ;;  %v2036_v6 = vpop.f32.mrf.mxu0 }
 0x473   : > { %v1491_v27 = vsel %vm1489_vm11, %v1490_v21, %v1488_v49  ;;  %v2004_v30 = vpop.f32.mrf.mxu1  ;;  %vm1515_vm2 = vcmp.eq.f32.partialorder %v2694_v19, inf  ;;  %v1518_v1 = vand.u32 2147483648, %v2694_v19  ;;  %vm1517_vm3 = vcmp.eq.f32.partialorder %v2694_v19, 0.0 }
 0x474   : > { %1579 = vst [vmem:[#allocation12 + $0x18] sm:$0xff] %v1491_v27  ;;  %v1383_v34 = vadd.f32 %v2030_v22, %v2004_v30  ;;  %v1481_v36 = vsel %vm1480_vm12, %v2682_v48, %v1479_v29  ;;  %2179 = vrsqrt.f32 %v2699_v25  ;;  %vm1508_vm4 = vcmp.eq.f32.partialorder %v2699_v25, inf  ;;  %v1397_v7 = vpop.f32.mrf.mxu0 }
 0x475   : > { %v1149_v37 = vpop.f32.mrf.mxu1  ;;  %v1484_v38 = vsel %vm1482_vm13, %v1483_v32, %v1481_v36  ;;  %v1511_v15 = vand.u32 2147483648, %v2699_v25  ;;  %vm1510_vm5 = vcmp.eq.f32.partialorder %v2699_v25, 0.0  ;;  %v1431_v30 = vmul.f32 2.0, %v2673_v26 }
 0x476   : > { %v1441_v40 = vsub.f32 %v1383_v34, %v1425_v23  ;;  %v1378_v42 = vadd.f32 %v1377_v55, %v1149_v37  ;;  %1578 = vst [vmem:[#allocation12 + $0x10] sm:$0xff] %v1484_v38  ;;  %v2039_v27 = vpop.f32.mrf.mxu0  ;;  %v1430_v38 = vmul.f32 2.0, %v2675_v28 }
 0x477   : > { %v2174_v43 = vpop.eup %2173 }
 0x478   : > { %v1500_v44 = vmul.f32 %v2174_v43, %v2686_v60  ;;  %v2708_v45 = vmax.f32 %v1441_v40, 0.0  ;;  %v1440_v31 = vsub.f32 %v1378_v42, %v1424_v35  ;;  %v1407_v42 = vpop.f32.mrf.mxu0 }
 0x479   : > { %v2176_v48 = vpop.eup %2175 }
 0x47a   : > { %v1502_v50 = vsel %vm1501_vm14, %v2686_v60, %v1500_v44  ;;  %2181 = vrsqrt.f32 %v2708_v45  ;;  %v1493_v52 = vmul.f32 %v2176_v48, %v2690_v5  ;;  %v2717_v53 = vmax.f32 %v1440_v31, 0.0 }
 0x47b   : > { %v1505_v33 = vsel %vm1503_vm15, %v1504_v57, %v1502_v50  ;;  %v2007_v54 = vpop.f32.mrf.mxu1  ;;  %vm1529_vm6 = vcmp.eq.f32.partialorder %v2708_v45, inf  ;;  %v1532_v10 = vand.u32 2147483648, %v2708_v45  ;;  %vm1531_vm7 = vcmp.eq.f32.partialorder %v2708_v45, 0.0 }
 0x47c   : > { %1581 = vst [vmem:[#allocation12 + $0x28] sm:$0xff] %v1505_v33  ;;  %v1393_v58 = vadd.f32 %v2033_v46, %v2007_v54  ;;  %v1495_v60 = vsel %vm1494_vm0, %v2690_v5, %v1493_v52  ;;  %2183 = vrsqrt.f32 %v2717_v53  ;;  %vm1522_vm8 = vcmp.eq.f32.partialorder %v2717_v53, inf }
 0x47d   : > { %v1159_v61 = vpop.f32.mrf.mxu1  ;;  %v1498_v62 = vsel %vm1496_vm1, %v1497_v56, %v1495_v60  ;;  %v1525_v55 = vand.u32 2147483648, %v2717_v53  ;;  %vm1524_vm9 = vcmp.eq.f32.partialorder %v2717_v53, 0.0 }
 0x47e   : > { %v1443_v39 = vsub.f32 %v1393_v58, %v1427_v51  ;;  %v1388_v0 = vadd.f32 %v1387_v63, %v1159_v61  ;;  %1580 = vst [vmem:[#allocation12 + $0x20] sm:$0xff] %v1498_v62 }
 0x47f   : > { %v2178_v2 = vpop.eup %2177 }
 0x480   : > { %v1514_v41 = vmul.f32 %v2178_v2, %v2694_v19  ;;  %v2726_v3 = vmax.f32 %v1443_v39, 0.0  ;;  %v1442_v4 = vsub.f32 %v1388_v0, %v1426_v59 }
 0x481   : > { %v2180_v5 = vpop.eup %2179 }
 0x482   : > { %v1516_v8 = vsel %vm1515_vm2, %v2694_v19, %v1514_v41  ;;  %2185 = vrsqrt.f32 %v2726_v3  ;;  %v1507_v12 = vmul.f32 %v2180_v5, %v2699_v25  ;;  %v2735_v13 = vmax.f32 %v1442_v4, 0.0 }
 0x483   : > { %v1519_v11 = vsel %vm1517_vm3, %v1518_v1, %v1516_v8  ;;  %v2010_v14 = vpop.f32.mrf.mxu1  ;;  %vm1543_vm10 = vcmp.eq.f32.partialorder %v2726_v3, inf  ;;  %v1546_v28 = vand.u32 2147483648, %v2726_v3  ;;  %vm1545_vm11 = vcmp.eq.f32.partialorder %v2726_v3, 0.0 }
 0x484   : > { %1583 = vst [vmem:[#allocation12 + $0x38] sm:$0xff] %v1519_v11  ;;  %v1403_v16 = vadd.f32 %v2036_v6, %v2010_v14  ;;  %v1509_v17 = vsel %vm1508_vm4, %v2699_v25, %v1507_v12  ;;  %2187 = vrsqrt.f32 %v2735_v13  ;;  %vm1536_vm12 = vcmp.eq.f32.partialorder %v2735_v13, inf }
 0x485   : > { %v1169_v18 = vpop.f32.mrf.mxu1  ;;  %v1512_v19 = vsel %vm1510_vm5, %v1511_v15, %v1509_v17  ;;  %v1539_v54 = vand.u32 2147483648, %v2735_v13  ;;  %vm1538_vm13 = vcmp.eq.f32.partialorder %v2735_v13, 0.0 }
 0x486   : > { %v1445_v20 = vsub.f32 %v1403_v16, %v1429_v9  ;;  %v1398_v21 = vadd.f32 %v1397_v7, %v1169_v18  ;;  %1582 = vst [vmem:[#allocation12 + $0x30] sm:$0xff] %v1512_v19 }
 0x487   : > { %v2182_v22 = vpop.eup %2181 }
 0x488   : > { %v1528_v24 = vmul.f32 %v2182_v22, %v2708_v45  ;;  %v1461_v49 = vmax.f32 %v1445_v20, 0.0  ;;  %v1444_v23 = vsub.f32 %v1398_v21, %v1428_v47 }
 0x489   : > { %v2184_v29 = vpop.eup %2183 }
 0x48a   : > { %v1530_v25 = vsel %vm1529_vm6, %v2708_v45, %v1528_v24  ;;  %2189 = vrsqrt.f32 %v1461_v49  ;;  %v1521_v34 = vmul.f32 %v2184_v29, %v2717_v53  ;;  %v1460_v35 = vmax.f32 %v1444_v23, 0.0 }
 0x48b   : > { %v1533_v32 = vsel %vm1531_vm7, %v1532_v10, %v1530_v25  ;;  %v2013_v36 = vpop.f32.mrf.mxu1  ;;  %vm1557_vm14 = vcmp.eq.f32.partialorder %v1461_v49, inf  ;;  %v1560_v63 = vand.u32 2147483648, %v1461_v49  ;;  %vm1559_vm15 = vcmp.eq.f32.partialorder %v1461_v49, 0.0 }
 0x48c   : > { %1585 = vst [vmem:[#allocation12 + $0x48] sm:$0xff] %v1533_v32  ;;  %v1413_v37 = vadd.f32 %v2039_v27, %v2013_v36  ;;  %v1523_v40 = vsel %vm1522_vm8, %v2717_v53, %v1521_v34  ;;  %2191 = vrsqrt.f32 %v1460_v35  ;;  %vm1550_vm0 = vcmp.eq.f32.partialorder %v1460_v35, inf }
 0x48d   : > { %v1179_v26 = vpop.f32.mrf.mxu1  ;;  %v1526_v43 = vsel %vm1524_vm9, %v1525_v55, %v1523_v40  ;;  %v1553_v2 = vand.u32 2147483648, %v1460_v35  ;;  %vm1552_vm1 = vcmp.eq.f32.partialorder %v1460_v35, 0.0 }
 0x48e   : > { %v1447_v44 = vsub.f32 %v1413_v37, %v1431_v30  ;;  %v1408_v45 = vadd.f32 %v1407_v42, %v1179_v26  ;;  %1584 = vst [vmem:[#allocation12 + $0x40] sm:$0xff] %v1526_v43 }
 0x48f   : > { %v2186_v31 = vpop.eup %2185 }
 0x490   : > { %v1542_v57 = vmul.f32 %v2186_v31, %v2726_v3  ;;  %v1463_v46 = vmax.f32 %v1447_v44, 0.0  ;;  %v1446_v48 = vsub.f32 %v1408_v45, %v1430_v38 }
 0x491   : > { %v2188_v50 = vpop.eup %2187 }
 0x492   : > { %v1544_v51 = vsel %vm1543_vm10, %v2726_v3, %v1542_v57  ;;  %2193 = vrsqrt.f32 %v1463_v46  ;;  %v1535_v52 = vmul.f32 %v2188_v50, %v2735_v13  ;;  %v1462_v53 = vmax.f32 %v1446_v48, 0.0 }
 0x493   : > { %v1547_v33 = vsel %vm1545_vm11, %v1546_v28, %v1544_v51  ;;  %vm1571_vm2 = vcmp.eq.f32.partialorder %v1463_v46, inf  ;;  %v1574_v6 = vand.u32 2147483648, %v1463_v46  ;;  %vm1573_vm3 = vcmp.eq.f32.partialorder %v1463_v46, 0.0 }
 0x494   : > { %1587 = vst [vmem:[#allocation12 + $0x58] sm:$0xff] %v1547_v33  ;;  %v1537_v56 = vsel %vm1536_vm12, %v2735_v13, %v1535_v52  ;;  %2195 = vrsqrt.f32 %v1462_v53  ;;  %vm1564_vm4 = vcmp.eq.f32.partialorder %v1462_v53, inf  ;;  %v1567_v12 = vand.u32 2147483648, %v1462_v53 }
 0x495   : > { %v1540_v58 = vsel %vm1538_vm13, %v1539_v54, %v1537_v56  ;;  %vm1566_vm5 = vcmp.eq.f32.partialorder %v1462_v53, 0.0 }
 0x496   : > { %1586 = vst [vmem:[#allocation12 + $0x50] sm:$0xff] %v1540_v58 }
 0x497   : > { %v2190_v59 = vpop.eup %2189 }
 0x498   : > { %v1556_v60 = vmul.f32 %v2190_v59, %v1461_v49 }
 0x499   : > { %v2192_v61 = vpop.eup %2191 }
 0x49a   : > { %v1558_v62 = vsel %vm1557_vm14, %v1461_v49, %v1556_v60  ;;  %v1549_v0 = vmul.f32 %v2192_v61, %v1460_v35 }
 0x49b   : > { %v1561_v39 = vsel %vm1559_vm15, %v1560_v63, %v1558_v62 }
 0x49c   : > { %1589 = vst [vmem:[#allocation12 + $0x68] sm:$0xff] %v1561_v39  ;;  %v1551_v41 = vsel %vm1550_vm0, %v1460_v35, %v1549_v0 }
 0x49d   : > { %v1554_v3 = vsel %vm1552_vm1, %v1553_v2, %v1551_v41 }
 0x49e   : > { %1588 = vst [vmem:[#allocation12 + $0x60] sm:$0xff] %v1554_v3 }
 0x49f   : > { %v2194_v4 = vpop.eup %2193 }
 0x4a0   : > { %v1570_v1 = vmul.f32 %v2194_v4, %v1463_v46 }
 0x4a1   : > { %v2196_v5 = vpop.eup %2195 }
 0x4a2   : > { %v1572_v8 = vsel %vm1571_vm2, %v1463_v46, %v1570_v1  ;;  %v1563_v11 = vmul.f32 %v2196_v5, %v1462_v53 }
 0x4a3   : > { %v1575_v9 = vsel %vm1573_vm3, %v1574_v6, %v1572_v8 }
 0x4a4   : > { %1591 = vst [vmem:[#allocation12 + $0x78] sm:$0xff] %v1575_v9  ;;  %v1565_v13 = vsel %vm1564_vm4, %v1462_v53, %v1563_v11 }
 0x4a5   : > { %v1568_v14 = vsel %vm1566_vm5, %v1567_v12, %v1565_v13 }
 0x4a6   : > { %1590 = vst [vmem:[#allocation12 + $0x70] sm:$0xff] %v1568_v14 }
 0x4a7 PF: > { %s2381_s21 = smov [#allocation10]   ;;  %s1835_s24 = sshll.u32 %s2432_s19, 8 }
 0x4a8   : > { %s1619_s6 = sshll.u32 %s2381_s21, 4  ;;  %s2769_s29 = scalar_lea.hbm %s2845_s2, %s1835_s24  ;;  %s1620_s6 = int_to_ptr.vmem [resolvable:$true] %s1619_s6 }
 0x4a9   : > { %s2251_s14 = scalar_lea.vmem %s1620_s6, 2048  ;;  %p2864_p8 = scmp.eq.s32.totalorder %s2432_s19, 1 }
 0x4aa   : > { %p2252_p7 = scmp.ne.s32.totalorder %s1620_s6, %s2251_s14  ;;  %p2258_p13 = scmp.lt.s32.totalorder %s1620_s6, %s1620_s6 }
 0x4ab   : > { %p2259_p0 = scmp.lt.s32.totalorder %s2251_s14, %s2251_s14 }
 0x4ac   : > { %p2253_p10 = pnand %p2252_p7, %p2864_p8 }
 0x4ad   : > { %p2260_p5 = por %p2259_p0, %p2258_p13 }
 0x4ae   : > { %p2254_p11 = pneg %p2253_p10 }
 0x4b0   : > { %p2261_p2 = pnand %p2260_p5, %p2254_p11 }
 0x4b2   : > { %2264 = shalt.err (!%p2261_p2)
}
 0x4b3   : > { %s2382_s11 = smov 128   ;;  %s2383_s20 = smov 8  }
 0x4b4   : > { %p2865_p1 = pmov %p2864_p8  ;;  %s1606_s8 = sshll.u32 %s2549_s5, 4  ;;  %s2782_s8 = int_to_ptr.vmem [resolvable:$true] %s1606_s8 }
 0x4b5   : > { %s2384_s12 = smov [#allocation12]   ;;  %s1593_s23 = scalar_lea.sflag [#allocation6], %s2534_s30 }
 0x4b6   : > { %2050 = dma.vmem_to_hbm [thread:$0]  (%p2865_p1), %s1620_s6, 2048, %s2846_s3, [#allocation11], %s2382_s11, %s2382_s11, %s2383_s20  }
 0x4b7   : > { %s2784_s13 = sshll.u32 %s2384_s12, 4  ;;  %s2275_s21 = scalar_lea.vmem %s2782_s8, 256  ;;  %s1633_s13 = int_to_ptr.vmem [resolvable:$true] %s2784_s13 }
 0x4b8   : > { %p2276_p4 = scmp.ne.s32.totalorder %s2782_s8, %s2275_s21  ;;  %p2866_p6 = scmp.ne.s32.totalorder %s2857_s10, 0 }
 0x4b9   : > { %s2385_s24 = smov [#allocation9]  }
 0x4ba   : > { %p2277_p9 = pnand %p2276_p4, %p2866_p6  ;;  %s2279_s26 = sshll.u32 %s2385_s24, 4  ;;  %s2280_s26 = int_to_ptr.vmem [resolvable:$false] %s2279_s26 }
 0x4bb   : > { %s2281_s28 = scalar_lea.vmem %s2280_s26, 512  ;;  %p2282_p12 = scmp.lt.s32.totalorder %s2782_s8, %s2280_s26 }
 0x4bc   : > { %p2278_p3 = pneg %p2277_p9  ;;  %p2283_p7 = scmp.lt.s32.totalorder %s2281_s28, %s2275_s21 }
 0x4be   : > { %p2284_p8 = por %p2283_p7, %p2282_p12 }
 0x4c0   : > { %p2285_p10 = pnand %p2284_p8, %p2278_p3 }
 0x4c2   : > { %2288 = shalt.err (!%p2285_p10)
}
 0x4c3   : > { %s2289_s5 = scalar_lea.hbm %s2769_s29, 256  ;;  %s2293_s14 = scalar_lea.hbm %s2845_s2, 512 }
 0x4c4   : > { %p2290_p11 = scmp.ne.s32.totalorder %s2769_s29, %s2289_s5  ;;  %p2294_p5 = scmp.lt.s32.totalorder %s2769_s29, %s2845_s2 }
 0x4c5   : > { %p2295_p2 = scmp.lt.s32.totalorder %s2293_s14, %s2289_s5 }
 0x4c6   : > { %p2291_p13 = pnand %p2290_p11, %p2866_p6 }
 0x4c7   : > { %p2296_p1 = por %p2295_p2, %p2294_p5 }
 0x4c8   : > { %p2292_p0 = pneg %p2291_p13 }
 0x4ca   : > { %p2297_p4 = pnand %p2296_p1, %p2292_p0 }
 0x4cc   : > { %2300 = shalt.err (!%p2297_p4)
}
 0x4cd   : > { %2048 = dma.vmem_to_hbm [thread:$0]  (%p2866_p6), %s2782_s8, 256, %s2769_s29, %s1593_s23, %s2382_s11, %s2382_s11, %s2383_s20  }
 0x4ce   : > { %s2301_s12 = scalar_lea.vmem %s1633_s13, 2048  ;;  %p2867_p3 = scmp.eq.s32.totalorder %s2432_s19, 1 }
 0x4cf   : > { %p2302_p9 = scmp.ne.s32.totalorder %s1633_s13, %s2301_s12  ;;  %p2308_p8 = scmp.lt.s32.totalorder %s1633_s13, %s1633_s13 }
 0x4d0   : > { %p2309_p10 = scmp.lt.s32.totalorder %s2301_s12, %s2301_s12 }
 0x4d1   : > { %p2303_p12 = pnand %p2302_p9, %p2867_p3 }
 0x4d2   : > { %p2310_p11 = por %p2309_p10, %p2308_p8 }
 0x4d3   : > { %p2304_p7 = pneg %p2303_p12 }
 0x4d5   : > { %p2311_p13 = pnand %p2310_p11, %p2304_p7 }
 0x4d7   : > { %2314 = shalt.err (!%p2311_p13)
}
 0x4d8   : > { %p2868_p0 = pmov %p2867_p3 }
 0x4da   : > { %2052 = dma.vmem_to_hbm [thread:$0]  (%p2868_p0), %s1633_s13, 2048, %s2847_s4, [#allocation11], %s2382_s11, %s2382_s11, %s2383_s20  }
 0x4db   : > { %p2869_p6 = pmov %p2868_p0 }
 0x4dc   : > { %p2870_p5 = pmov %p2868_p0 }
 0x4dd   : > { %2350 = dma.done.wait (%p2869_p6), [#allocation11], 4096  }
 0x4de   : > { %2352 = vsyncadd (%p2870_p5), [#allocation11], 4294963200 }
 0x4df PF: > { %s1655_s29 = sand.u32 1, %s2359_s15   ;;  %p2871_p2 = scmp.ne.s32.totalorder %s2853_s22, 0 }
 0x4e0   : > { %p2872_p1 = scmp.ge.s32.totalorder %s2371_s18, 2  ;;  %s1656_s8 = scalar_lea.sflag [#allocation6], %s1655_s29 }
 0x4e2   : > { %p2067_p4 = pnand %p2872_p1, %p2871_p2 }
 0x4e4   : > { %p2068_p9 = pneg %p2067_p4 }
 0x4e6   : > { %2354 = dma.done.wait (%p2068_p9), %s1656_s8, 256  }
 0x4e7   : > { %2356 = vsyncadd (%p2068_p9), %s1656_s8, 4294967040  ;;  %p20_p3 = scmp.ge.s32.totalorder %s2466_s27, 4   ;;  %s2873_s15 = smov %s2363_s16 }
 0x4e8   : > { %s2874_s16 = smov %s2367_s17  ;;  %s2875_s17 = smov %s2486_s9 }
 0x4e9   : > { %s2876_s18 = smov %s2466_s27  ;;  %22 = sbr.rel (!%p20_p3) target bundleno = 7 (0x7), region = 101 }
 0x4ee   :  { %1661 = vsyncpa [#allocation5], 1 }
 0x4ef   :  { %1663 = vsyncpa [#allocation5 + $0x1], 1 }
 0x4f0   :  { %1664 = vsyncpa [#allocation8], 1 }
 0x4f1   :  { %1665 = vsyncpa [#allocation6], 1 }
 0x4f2   :  { %1667 = vsyncpa [#allocation6 + $0x1], 1 }
 0x4f3   :  { %1668 = vsyncpa [#allocation11], 1 }

</bundles_post_ra>
